<compile_context>
chip_gen: v5e
topology: v5e:2x2
jax: 0.10.0
libtpu: 0.0.40
codegen_flags: <defaults>
</compile_context>

<pallas_src>
import jax
import jax.numpy as jnp
from jax import lax
from jax.experimental import pallas as pl
from jax.experimental.pallas import tpu as pltpu


# For a 3x3 / stride-2 / pad-1 window, kernel offset k in {0,1,2} maps to
# (source row/col parity, start index inside the top/left zero-padded quadrant plane).
#   k=0 -> source 2*o-1: odd parity, shifted into the zero-pad row/col (start 0)
#   k=1 -> source 2*o  : even parity, unshifted (start 1)
#   k=2 -> source 2*o+1: odd parity, unshifted (start 1)
_TAP = {0: (1, 0), 1: (0, 1), 2: (1, 1)}


# --------------------------------------------------------------------------- #
# Fused kernel
# --------------------------------------------------------------------------- #

def _build_kernel(cin, mid, ce, nb, ho, wo):
    C = mid + cin          # scratch lane count: [compress output | raw-input copy]
    cout = ce + cin
    npix = ho * wo
    npl = 4 * nb           # quadrant-major planes in the scratch (plane = q*nb + b)

    def kernel(x_ref, w1_ref, wcomb_ref, vmid_ref, w3_ref, vce_ref, o_ref, zpad_ref):
        # x_ref    : VMEM (4, nb, ho*wo, cin)    quadrant-split input pixels (q-major)
        # w1_ref   : VMEM (cin, mid)             compress 1x1 weights (BN folded)
        # wcomb_ref: VMEM (9, mid+cin)           per-tap lane weights [dw*bn_scale | 1/9]
        # vmid_ref : VMEM (4, mid)               rows: b1f, s1b, o1b, dw-BN offset
        # w3_ref   : VMEM (mid, ce)              expand 1x1 weights (dw_bn2 + BN folded)
        # vce_ref  : VMEM (3, ce)                rows: b3f, s3b, o3b
        # o_ref    : VMEM (nb, ho*wo, ce+cin)    channels-last output block
        # zpad_ref : VMEM (4*nb, ho+1, wo+1, C)  zero-bordered quadrant scratch

        # ---- zero ONLY the 1-wide top/left border (interior fully rewritten below) ----
        zpad_ref[:, 0:1, :, :] = jnp.zeros((npl, 1, wo + 1, C), jnp.float32)
        zpad_ref[:, :, 0:1, :] = jnp.zeros((npl, ho + 1, 1, C), jnp.float32)

        xv = x_ref[...]                                     # (4, nb, npix, cin)

        # ---- stage 1: compress 1x1 (+BN+ReLU+compress_bn1+ReLU) on the MXU ------------
        # One matmul over every pixel of every image in this batch block.
        z = jnp.dot(xv.reshape(npl * npix, cin), w1_ref[...],
                    preferred_element_type=jnp.float32)
        z = jnp.maximum(z + vmid_ref[0:1, :], 0.0)
        z = jnp.maximum(z * vmid_ref[1:2, :] + vmid_ref[2:3, :], 0.0)
        # ChannelShuffle with groups=1 is the identity.
        # TODO(synk): for groups > 1, permute the channel (lane) axis of z here.

        # Interior of the zero-bordered quadrant scratch: compress output in lanes [:mid],
        # a copy of the raw input (for the avgpool identity branch) in lanes [mid:].
        zpad_ref[:, 1:, 1:, :] = jnp.concatenate(
            [z.reshape(npl, ho, wo, mid), xv.reshape(npl, ho, wo, cin)], axis=-1)

        # ---- stage 2 + identity branch: dw 3x3/s2 conv and 3x3/s2 avgpool, fused -------
        acc = None
        for ky in range(3):
            pr, r0 = _TAP[ky]
            for kx in range(3):
                pc, c0 = _TAP[kx]
                q = 2 * pr + pc
                t = 3 * ky + kx
                tap = zpad_ref[q * nb:(q + 1) * nb, r0:r0 + ho, c0:c0 + wo, :]
                term = tap * wcomb_ref[t:t + 1, :]          # (nb, ho, wo, C)
                acc = term if acc is None else acc + term
        h = jnp.maximum(acc[..., :mid] + vmid_ref[3:4, :], 0.0)   # dw branch (+BN, ReLU)
        pool = jnp.maximum(acc[..., mid:], 0.0)                   # avgpool + final ReLU

        # ---- stage 3: expand 1x1 (+dw_bn2+BN+ReLU+expand_bn3+final ReLU) on the MXU ----
        e = jnp.dot(h.reshape(nb * npix, mid), w3_ref[...],
                    preferred_element_type=jnp.float32)
        e = jnp.maximum(e + vce_ref[0:1, :], 0.0)
        e = jnp.maximum(e * vce_ref[1:2, :] + vce_ref[2:3, :], 0.0)

        # ---- concat([expand, avgpool]) -> one whole-block store -------------------------
        o_ref[...] = jnp.concatenate(
            [e.reshape(nb, npix, ce), pool.reshape(nb, npix, cin)], axis=-1)

    return kernel


# --------------------------------------------------------------------------- #
# Parameter folding / packing (inference-mode BN folded into the convs)
# --------------------------------------------------------------------------- #

def _pack_params(p):
    cin, mid = p["w1"].shape
    ce = p["w3"].shape[1]
    f = jnp.float32
    v = lambda a: a.reshape(-1).astype(f)

    s1a, o1a = v(p["s1a"]), v(p["o1a"])
    s1b, o1b = v(p["s1b"]), v(p["o1b"])
    s2a, o2a = v(p["s2a"]), v(p["o2a"])
    s2b, o2b = v(p["s2b"]), v(p["o2b"])
    s3a, o3a = v(p["s3a"]), v(p["o3a"])
    s3b, o3b = v(p["s3b"]), v(p["o3b"])
    b1, b3 = v(p["b1"]), v(p["b3"])

    w1f = (p["w1"] * s1a[None, :]).astype(f)               # fold compress ConvNormAct BN
    b1f = b1 * s1a + o1a
    wdwf = (p["wdw"] * s2a[None, :]).astype(f)             # fold dw ConvNormAct BN scale
    w3f = ((s2b[:, None] * p["w3"]) * s3a[None, :]).astype(f)  # fold dw_bn2 + expand BN
    b3f = (o2b @ p["w3"] + b3) * s3a + o3a

    # Per-tap lane weights for the fused dw-conv + avgpool accumulation.
    wcomb = jnp.concatenate([wdwf, jnp.full((9, cin), 1.0 / 9.0, f)], axis=1)
    vmid = jnp.stack([b1f, s1b, o1b, o2a]).astype(f)       # (4, mid)
    vce = jnp.stack([b3f, s3b, o3b]).astype(f)             # (3, ce)
    return w1f, wcomb, vmid, w3f, vce


# --------------------------------------------------------------------------- #
# Wrapper: layout prep (space-to-depth) + single pallas_call
# --------------------------------------------------------------------------- #

def shuffle_unit_reduction(x_nchw, p, n_steps=2):
    n, cin, h, w = x_nchw.shape
    assert h % 2 == 0 and w % 2 == 0, "stride-2 quadrant layout needs even H, W"
    mid = p["w1"].shape[1]
    ce = p["w3"].shape[1]
    cout = ce + cin
    ho, wo = h // 2, w // 2
    npix = ho * wo

    # Batch blocking: default 2 "parallel" steps keeps both v7x TensorCores busy while
    # amortizing the fixed per-grid-step overhead over nb images per step.  On the
    # single-TC v5e/v6e pass n_steps=1 to drop the second step's overhead as well.
    n_steps = max(1, min(n_steps, n))
    assert n % n_steps == 0, "batch must divide evenly into grid steps"
    nb = n // n_steps

    w1f, wcomb, vmid, w3f, vce = _pack_params(p)
    C = mid + cin

    # Space-to-depth (pixel unshuffle) into the 4 stride-2 parity quadrants, quadrant-major
    # and channels-last: the 1x1 convs become (pixels, C) matmuls and every 3x3/stride-2
    # tap (dw conv AND avgpool) is a static slice of the zero-bordered VMEM scratch.
    xq = x_nchw.astype(jnp.float32).reshape(n, cin, ho, 2, wo, 2)
    xq = xq.transpose(3, 5, 0, 2, 4, 1).reshape(4, n, npix, cin)

    kernel = _build_kernel(cin, mid, ce, nb, ho, wo)

    out = pl.pallas_call(
        kernel,
        out_shape=jax.ShapeDtypeStruct((n, npix, cout), jnp.float32),
        grid=(n_steps,),
        in_specs=[
            pl.BlockSpec((4, nb, npix, cin), lambda i: (0, i, 0, 0)),   # image quadrants
            pl.BlockSpec((cin, mid), lambda i: (0, 0)),                 # compress weights
            pl.BlockSpec((9, C), lambda i: (0, 0)),                     # fused tap weights
            pl.BlockSpec((4, mid), lambda i: (0, 0)),                   # mid-ch affines
            pl.BlockSpec((mid, ce), lambda i: (0, 0)),                  # expand weights
            pl.BlockSpec((3, ce), lambda i: (0, 0)),                    # ce-ch affines
        ],
        out_specs=pl.BlockSpec((nb, npix, cout), lambda i: (i, 0, 0)),
        scratch_shapes=[pltpu.VMEM((4 * nb, ho + 1, wo + 1, C), jnp.float32)],
        compiler_params=pltpu.CompilerParams(
            dimension_semantics=("parallel",),   # independent batch blocks -> both v7x TCs
        ),
    )(xq, w1f, wcomb, vmid, w3f, vce)

    # Layout plumbing only: channels-last pixel rows back to NCHW.
    return out.reshape(n, ho, wo, cout).transpose(0, 3, 1, 2)


# --------------------------------------------------------------------------- #
# Params & pure-JAX reference
# --------------------------------------------------------------------------- #

def _bn_fold(gamma, beta, mean, var, eps=1e-5):
    scale = gamma / jnp.sqrt(var + eps)
    return scale.reshape(1, -1), (beta - mean * scale).reshape(1, -1)


def make_params(key, cin, cout):
    mid = cout // 4
    ce = cout - cin if (cout - cin) >= 2 else cout
    keys = iter(jax.random.split(key, 32))

    def bn(c):
        g = 0.5 + jax.random.uniform(next(keys), (c,), jnp.float32)
        b = 0.1 * jax.random.normal(next(keys), (c,), jnp.float32)
        m = 0.1 * jax.random.normal(next(keys), (c,), jnp.float32)
        v = 0.5 + jax.random.uniform(next(keys), (c,), jnp.float32)
        return _bn_fold(g, b, m, v)

    p = {}
    p["w1"] = 0.2 * jax.random.normal(next(keys), (cin, mid), jnp.float32)
    p["b1"] = 0.1 * jax.random.normal(next(keys), (1, mid), jnp.float32)
    p["s1a"], p["o1a"] = bn(mid)          # BN inside compress ConvNormAct
    p["s1b"], p["o1b"] = bn(mid)          # compress_bn1
    p["wdw"] = 0.2 * jax.random.normal(next(keys), (9, mid), jnp.float32)
    p["s2a"], p["o2a"] = bn(mid)          # BN inside dw ConvNormAct
    p["s2b"], p["o2b"] = bn(mid)          # dw_bn2
    p["w3"] = 0.2 * jax.random.normal(next(keys), (mid, ce), jnp.float32)
    p["b3"] = 0.1 * jax.random.normal(next(keys), (1, ce), jnp.float32)
    p["s3a"], p["o3a"] = bn(ce)           # BN inside expand ConvNormAct
    p["s3b"], p["o3b"] = bn(ce)           # expand_bn3
    return p


def ref_forward(x_nchw, p):
    relu = lambda a: jnp.maximum(a, 0.0)
    x = jnp.transpose(x_nchw, (0, 2, 3, 1))
    mid = p["w1"].shape[1]
    z = jnp.einsum("nhwc,cd->nhwd", x, p["w1"]) + p["b1"].reshape(-1)
    z = relu(z * p["s1a"].reshape(-1) + p["o1a"].reshape(-1))
    z = relu(z * p["s1b"].reshape(-1) + p["o1b"].reshape(-1))
    k = p["wdw"].reshape(3, 3, mid)[:, :, None, :]
    z = lax.conv_general_dilated(z, k, (2, 2), ((1, 1), (1, 1)),
                                 dimension_numbers=("NHWC", "HWIO", "NHWC"),
                                 feature_group_count=mid)
    z = relu(z * p["s2a"].reshape(-1) + p["o2a"].reshape(-1))
    z = z * p["s2b"].reshape(-1) + p["o2b"].reshape(-1)
    z = jnp.einsum("nhwc,cd->nhwd", z, p["w3"]) + p["b3"].reshape(-1)
    z = relu(z * p["s3a"].reshape(-1) + p["o3a"].reshape(-1))
    z = z * p["s3b"].reshape(-1) + p["o3b"].reshape(-1)
    idp = lax.reduce_window(x, 0.0, lax.add, (1, 3, 3, 1), (1, 2, 2, 1),
                            ((0, 0), (1, 1), (1, 1), (0, 0))) / 9.0
    out = relu(jnp.concatenate([z, idp], axis=-1))
    return jnp.transpose(out, (0, 3, 1, 2))


# --------------------------------------------------------------------------- #
# main
# --------------------------------------------------------------------------- #

if __name__ == "__main__":
    key = jax.random.PRNGKey(0)
    kp, kx = jax.random.split(key)
    # N=4 so the batch-blocked grid runs 2 images per step over 2 "parallel" steps.
    N, CIN, COUT, H, W = 4, 4, 16, 16, 16      # downsample=True -> out (N, 16, 8, 8)

    params = make_params(kp, CIN, COUT)
    x = jax.random.normal(kx, (N, CIN, H, W), jnp.float32)

    out = jax.jit(lambda a: shuffle_unit_reduction(a, params))(x)
    out = jax.block_until_ready(out)

    ref = ref_forward(x, params)
    assert out.shape == (N, COUT, H // 2, W // 2), out.shape
    assert jnp.allclose(out, ref, atol=1e-3, rtol=1e-3), float(jnp.abs(out - ref).max())
    print("KERNEL_OK")
</pallas_src>

<mosaic_0001>
module attributes {stable_mosaic.version = 11 : i64} {
  func.func @kernel(%arg0: i32, %arg1: memref<4x2x64x4xf32, #tpu.memory_space<vmem>>, %arg2: memref<4x4xf32, #tpu.memory_space<vmem>>, %arg3: memref<9x8xf32, #tpu.memory_space<vmem>>, %arg4: memref<4x4xf32, #tpu.memory_space<vmem>>, %arg5: memref<4x12xf32, #tpu.memory_space<vmem>>, %arg6: memref<3x12xf32, #tpu.memory_space<vmem>>, %arg7: memref<2x64x16xf32, #tpu.memory_space<vmem>>, %arg8: memref<8x9x9x8xf32, #tpu.memory_space<vmem>>) attributes {dimension_semantics = [#tpu.dimension_semantics<parallel>], iteration_bounds = array<i64: 2>, scalar_prefetch = 0 : i64, scratch_operands = 1 : i64, tpu.core_type = #tpu.core_type<tc>, window_params = [{transform_indices = @transform_0, window_bounds = array<i64: 4, 2, 64, 4>}, {pipeline_mode = #tpu.pipeline_mode<synchronous>, transform_indices = @transform_1, window_bounds = array<i64: 4, 4>}, {pipeline_mode = #tpu.pipeline_mode<synchronous>, transform_indices = @transform_2, window_bounds = array<i64: 9, 8>}, {pipeline_mode = #tpu.pipeline_mode<synchronous>, transform_indices = @transform_3, window_bounds = array<i64: 4, 4>}, {pipeline_mode = #tpu.pipeline_mode<synchronous>, transform_indices = @transform_4, window_bounds = array<i64: 4, 12>}, {pipeline_mode = #tpu.pipeline_mode<synchronous>, transform_indices = @transform_5, window_bounds = array<i64: 3, 12>}, {transform_indices = @transform_6, window_bounds = array<i64: 2, 64, 16>}]} {
    %cst = arith.constant 0.000000e+00 : f32
    %0 = vector.broadcast %cst : f32 to vector<8x1x9x8xf32>
    %c0 = arith.constant 0 : index
    %c0_0 = arith.constant 0 : index
    %c0_1 = arith.constant 0 : index
    %c0_2 = arith.constant 0 : index
    %1 = vector.load %arg8[%c0, %c0_0, %c0_1, %c0_2] : memref<8x9x9x8xf32, #tpu.memory_space<vmem>>, vector<8x1x9x8xf32>
    tpu.vector_store %arg8[%c0, %c0_0, %c0_1, %c0_2], %0 {strides = array<i32>} : memref<8x9x9x8xf32, #tpu.memory_space<vmem>>, vector<8x1x9x8xf32>,
    %cst_3 = arith.constant 0.000000e+00 : f32
    %2 = vector.broadcast %cst_3 : f32 to vector<8x9x1x8xf32>
    %c0_4 = arith.constant 0 : index
    %c0_5 = arith.constant 0 : index
    %c0_6 = arith.constant 0 : index
    %c0_7 = arith.constant 0 : index
    %3 = vector.load %arg8[%c0_4, %c0_5, %c0_6, %c0_7] : memref<8x9x9x8xf32, #tpu.memory_space<vmem>>, vector<8x9x1x8xf32>
    tpu.vector_store %arg8[%c0_4, %c0_5, %c0_6, %c0_7], %2 {strides = array<i32>} : memref<8x9x9x8xf32, #tpu.memory_space<vmem>>, vector<8x9x1x8xf32>,
    %c0_8 = arith.constant 0 : index
    %c0_9 = arith.constant 0 : index
    %c0_10 = arith.constant 0 : index
    %c0_11 = arith.constant 0 : index
    %4 = vector.load %arg1[%c0_8, %c0_9, %c0_10, %c0_11] : memref<4x2x64x4xf32, #tpu.memory_space<vmem>>, vector<4x2x64x4xf32>
    %5 = vector.shape_cast %4 : vector<4x2x64x4xf32> to vector<512x4xf32>
    %c0_12 = arith.constant 0 : index
    %c0_13 = arith.constant 0 : index
    %6 = vector.load %arg2[%c0_12, %c0_13] : memref<4x4xf32, #tpu.memory_space<vmem>>, vector<4x4xf32>
    %cst_14 = arith.constant dense<0.000000e+00> : vector<512x4xf32>
    %7 = tpu.matmul %5, %6, %cst_14 {dimension_numbers = #tpu.dot_dimension_numbers<[1], [0], [0], [1], [0, 0, 1, 1], [], []>} : vector<512x4xf32>, vector<4x4xf32>, vector<512x4xf32> -> vector<512x4xf32>
    %c0_15 = arith.constant 0 : index
    %c0_16 = arith.constant 0 : index
    %8 = vector.load %arg4[%c0_15, %c0_16] : memref<4x4xf32, #tpu.memory_space<vmem>>, vector<1x4xf32>
    %9 = vector.broadcast %8 : vector<1x4xf32> to vector<512x4xf32>
    %10 = arith.addf %7, %9 : vector<512x4xf32>
    %cst_17 = arith.constant 0.000000e+00 : f32
    %11 = vector.broadcast %cst_17 : f32 to vector<512x4xf32>
    %12 = arith.maximumf %10, %11 : vector<512x4xf32>
    %c1 = arith.constant 1 : index
    %c0_18 = arith.constant 0 : index
    %13 = vector.load %arg4[%c1, %c0_18] : memref<4x4xf32, #tpu.memory_space<vmem>>, vector<1x4xf32>
    %14 = vector.broadcast %13 : vector<1x4xf32> to vector<512x4xf32>
    %15 = arith.mulf %12, %14 : vector<512x4xf32>
    %c2 = arith.constant 2 : index
    %c0_19 = arith.constant 0 : index
    %16 = vector.load %arg4[%c2, %c0_19] : memref<4x4xf32, #tpu.memory_space<vmem>>, vector<1x4xf32>
    %17 = vector.broadcast %16 : vector<1x4xf32> to vector<512x4xf32>
    %18 = arith.addf %15, %17 : vector<512x4xf32>
    %cst_20 = arith.constant 0.000000e+00 : f32
    %19 = vector.broadcast %cst_20 : f32 to vector<512x4xf32>
    %20 = arith.maximumf %18, %19 : vector<512x4xf32>
    %21 = vector.shape_cast %20 : vector<512x4xf32> to vector<8x8x8x4xf32>
    %22 = vector.shape_cast %4 : vector<4x2x64x4xf32> to vector<8x8x8x4xf32>
    %23 = tpu.concatenate %21, %22 in 3 : vector<8x8x8x4xf32>, vector<8x8x8x4xf32> -> vector<8x8x8x8xf32>
    %c0_21 = arith.constant 0 : index
    %c1_22 = arith.constant 1 : index
    %c1_23 = arith.constant 1 : index
    %c0_24 = arith.constant 0 : index
    %24 = vector.load %arg8[%c0_21, %c1_22, %c1_23, %c0_24] : memref<8x9x9x8xf32, #tpu.memory_space<vmem>>, vector<8x8x8x8xf32>
    tpu.vector_store %arg8[%c0_21, %c1_22, %c1_23, %c0_24], %23 {strides = array<i32>} : memref<8x9x9x8xf32, #tpu.memory_space<vmem>>, vector<8x8x8x8xf32>,
    %c6 = arith.constant 6 : index
    %c0_25 = arith.constant 0 : index
    %c0_26 = arith.constant 0 : index
    %c0_27 = arith.constant 0 : index
    %25 = vector.load %arg8[%c6, %c0_25, %c0_26, %c0_27] : memref<8x9x9x8xf32, #tpu.memory_space<vmem>>, vector<2x8x8x8xf32>
    %c0_28 = arith.constant 0 : index
    %c0_29 = arith.constant 0 : index
    %26 = vector.load %arg3[%c0_28, %c0_29] : memref<9x8xf32, #tpu.memory_space<vmem>>, vector<1x8xf32>
    %27 = vector.shape_cast %26 : vector<1x8xf32> to vector<1x1x1x8xf32>
    %28 = vector.broadcast %27 : vector<1x1x1x8xf32> to vector<2x8x8x8xf32>
    %29 = arith.mulf %25, %28 : vector<2x8x8x8xf32>
    %c4 = arith.constant 4 : index
    %c0_30 = arith.constant 0 : index
    %c1_31 = arith.constant 1 : index
    %c0_32 = arith.constant 0 : index
    %30 = vector.load %arg8[%c4, %c0_30, %c1_31, %c0_32] : memref<8x9x9x8xf32, #tpu.memory_space<vmem>>, vector<2x8x8x8xf32>
    %c1_33 = arith.constant 1 : index
    %c0_34 = arith.constant 0 : index
    %31 = vector.load %arg3[%c1_33, %c0_34] : memref<9x8xf32, #tpu.memory_space<vmem>>, vector<1x8xf32>
    %32 = vector.shape_cast %31 : vector<1x8xf32> to vector<1x1x1x8xf32>
    %33 = vector.broadcast %32 : vector<1x1x1x8xf32> to vector<2x8x8x8xf32>
    %34 = arith.mulf %30, %33 : vector<2x8x8x8xf32>
    %35 = arith.addf %29, %34 : vector<2x8x8x8xf32>
    %c6_35 = arith.constant 6 : index
    %c0_36 = arith.constant 0 : index
    %c1_37 = arith.constant 1 : index
    %c0_38 = arith.constant 0 : index
    %36 = vector.load %arg8[%c6_35, %c0_36, %c1_37, %c0_38] : memref<8x9x9x8xf32, #tpu.memory_space<vmem>>, vector<2x8x8x8xf32>
    %c2_39 = arith.constant 2 : index
    %c0_40 = arith.constant 0 : index
    %37 = vector.load %arg3[%c2_39, %c0_40] : memref<9x8xf32, #tpu.memory_space<vmem>>, vector<1x8xf32>
    %38 = vector.shape_cast %37 : vector<1x8xf32> to vector<1x1x1x8xf32>
    %39 = vector.broadcast %38 : vector<1x1x1x8xf32> to vector<2x8x8x8xf32>
    %40 = arith.mulf %36, %39 : vector<2x8x8x8xf32>
    %41 = arith.addf %35, %40 : vector<2x8x8x8xf32>
    %c2_41 = arith.constant 2 : index
    %c1_42 = arith.constant 1 : index
    %c0_43 = arith.constant 0 : index
    %c0_44 = arith.constant 0 : index
    %42 = vector.load %arg8[%c2_41, %c1_42, %c0_43, %c0_44] : memref<8x9x9x8xf32, #tpu.memory_space<vmem>>, vector<2x8x8x8xf32>
    %c3 = arith.constant 3 : index
    %c0_45 = arith.constant 0 : index
    %43 = vector.load %arg3[%c3, %c0_45] : memref<9x8xf32, #tpu.memory_space<vmem>>, vector<1x8xf32>
    %44 = vector.shape_cast %43 : vector<1x8xf32> to vector<1x1x1x8xf32>
    %45 = vector.broadcast %44 : vector<1x1x1x8xf32> to vector<2x8x8x8xf32>
    %46 = arith.mulf %42, %45 : vector<2x8x8x8xf32>
    %47 = arith.addf %41, %46 : vector<2x8x8x8xf32>
    %c0_46 = arith.constant 0 : index
    %c1_47 = arith.constant 1 : index
    %c1_48 = arith.constant 1 : index
    %c0_49 = arith.constant 0 : index
    %48 = vector.load %arg8[%c0_46, %c1_47, %c1_48, %c0_49] : memref<8x9x9x8xf32, #tpu.memory_space<vmem>>, vector<2x8x8x8xf32>
    %c4_50 = arith.constant 4 : index
    %c0_51 = arith.constant 0 : index
    %49 = vector.load %arg3[%c4_50, %c0_51] : memref<9x8xf32, #tpu.memory_space<vmem>>, vector<1x8xf32>
    %50 = vector.shape_cast %49 : vector<1x8xf32> to vector<1x1x1x8xf32>
    %51 = vector.broadcast %50 : vector<1x1x1x8xf32> to vector<2x8x8x8xf32>
    %52 = arith.mulf %48, %51 : vector<2x8x8x8xf32>
    %53 = arith.addf %47, %52 : vector<2x8x8x8xf32>
    %c2_52 = arith.constant 2 : index
    %c1_53 = arith.constant 1 : index
    %c1_54 = arith.constant 1 : index
    %c0_55 = arith.constant 0 : index
    %54 = vector.load %arg8[%c2_52, %c1_53, %c1_54, %c0_55] : memref<8x9x9x8xf32, #tpu.memory_space<vmem>>, vector<2x8x8x8xf32>
    %c5 = arith.constant 5 : index
    %c0_56 = arith.constant 0 : index
    %55 = vector.load %arg3[%c5, %c0_56] : memref<9x8xf32, #tpu.memory_space<vmem>>, vector<1x8xf32>
    %56 = vector.shape_cast %55 : vector<1x8xf32> to vector<1x1x1x8xf32>
    %57 = vector.broadcast %56 : vector<1x1x1x8xf32> to vector<2x8x8x8xf32>
    %58 = arith.mulf %54, %57 : vector<2x8x8x8xf32>
    %59 = arith.addf %53, %58 : vector<2x8x8x8xf32>
    %c6_57 = arith.constant 6 : index
    %c1_58 = arith.constant 1 : index
    %c0_59 = arith.constant 0 : index
    %c0_60 = arith.constant 0 : index
    %60 = vector.load %arg8[%c6_57, %c1_58, %c0_59, %c0_60] : memref<8x9x9x8xf32, #tpu.memory_space<vmem>>, vector<2x8x8x8xf32>
    %c6_61 = arith.constant 6 : index
    %c0_62 = arith.constant 0 : index
    %61 = vector.load %arg3[%c6_61, %c0_62] : memref<9x8xf32, #tpu.memory_space<vmem>>, vector<1x8xf32>
    %62 = vector.shape_cast %61 : vector<1x8xf32> to vector<1x1x1x8xf32>
    %63 = vector.broadcast %62 : vector<1x1x1x8xf32> to vector<2x8x8x8xf32>
    %64 = arith.mulf %60, %63 : vector<2x8x8x8xf32>
    %65 = arith.addf %59, %64 : vector<2x8x8x8xf32>
    %c4_63 = arith.constant 4 : index
    %c1_64 = arith.constant 1 : index
    %c1_65 = arith.constant 1 : index
    %c0_66 = arith.constant 0 : index
    %66 = vector.load %arg8[%c4_63, %c1_64, %c1_65, %c0_66] : memref<8x9x9x8xf32, #tpu.memory_space<vmem>>, vector<2x8x8x8xf32>
    %c7 = arith.constant 7 : index
    %c0_67 = arith.constant 0 : index
    %67 = vector.load %arg3[%c7, %c0_67] : memref<9x8xf32, #tpu.memory_space<vmem>>, vector<1x8xf32>
    %68 = vector.shape_cast %67 : vector<1x8xf32> to vector<1x1x1x8xf32>
    %69 = vector.broadcast %68 : vector<1x1x1x8xf32> to vector<2x8x8x8xf32>
    %70 = arith.mulf %66, %69 : vector<2x8x8x8xf32>
    %71 = arith.addf %65, %70 : vector<2x8x8x8xf32>
    %c6_68 = arith.constant 6 : index
    %c1_69 = arith.constant 1 : index
    %c1_70 = arith.constant 1 : index
    %c0_71 = arith.constant 0 : index
    %72 = vector.load %arg8[%c6_68, %c1_69, %c1_70, %c0_71] : memref<8x9x9x8xf32, #tpu.memory_space<vmem>>, vector<2x8x8x8xf32>
    %c8 = arith.constant 8 : index
    %c0_72 = arith.constant 0 : index
    %73 = vector.load %arg3[%c8, %c0_72] : memref<9x8xf32, #tpu.memory_space<vmem>>, vector<1x8xf32>
    %74 = vector.shape_cast %73 : vector<1x8xf32> to vector<1x1x1x8xf32>
    %75 = vector.broadcast %74 : vector<1x1x1x8xf32> to vector<2x8x8x8xf32>
    %76 = arith.mulf %72, %75 : vector<2x8x8x8xf32>
    %77 = arith.addf %71, %76 : vector<2x8x8x8xf32>
    %78 = vector.extract_strided_slice %77 {offsets = [0, 0, 0, 0], sizes = [2, 8, 8, 4], strides = [1, 1, 1, 1]} : vector<2x8x8x8xf32> to vector<2x8x8x4xf32>
    %c3_73 = arith.constant 3 : index
    %c0_74 = arith.constant 0 : index
    %79 = vector.load %arg4[%c3_73, %c0_74] : memref<4x4xf32, #tpu.memory_space<vmem>>, vector<1x4xf32>
    %80 = vector.shape_cast %79 : vector<1x4xf32> to vector<1x1x1x4xf32>
    %81 = vector.broadcast %80 : vector<1x1x1x4xf32> to vector<2x8x8x4xf32>
    %82 = arith.addf %78, %81 : vector<2x8x8x4xf32>
    %cst_75 = arith.constant 0.000000e+00 : f32
    %83 = vector.broadcast %cst_75 : f32 to vector<2x8x8x4xf32>
    %84 = arith.maximumf %82, %83 : vector<2x8x8x4xf32>
    %85 = vector.extract_strided_slice %77 {offsets = [0, 0, 0, 4], sizes = [2, 8, 8, 4], strides = [1, 1, 1, 1]} : vector<2x8x8x8xf32> to vector<2x8x8x4xf32>
    %cst_76 = arith.constant 0.000000e+00 : f32
    %86 = vector.broadcast %cst_76 : f32 to vector<2x8x8x4xf32>
    %87 = arith.maximumf %85, %86 : vector<2x8x8x4xf32>
    %88 = vector.shape_cast %84 : vector<2x8x8x4xf32> to vector<128x4xf32>
    %c0_77 = arith.constant 0 : index
    %c0_78 = arith.constant 0 : index
    %89 = vector.load %arg5[%c0_77, %c0_78] : memref<4x12xf32, #tpu.memory_space<vmem>>, vector<4x12xf32>
    %cst_79 = arith.constant dense<0.000000e+00> : vector<128x12xf32>
    %90 = tpu.matmul %88, %89, %cst_79 {dimension_numbers = #tpu.dot_dimension_numbers<[1], [0], [0], [1], [0, 0, 1, 1], [], []>} : vector<128x4xf32>, vector<4x12xf32>, vector<128x12xf32> -> vector<128x12xf32>
    %c0_80 = arith.constant 0 : index
    %c0_81 = arith.constant 0 : index
    %91 = vector.load %arg6[%c0_80, %c0_81] : memref<3x12xf32, #tpu.memory_space<vmem>>, vector<1x12xf32>
    %92 = vector.broadcast %91 : vector<1x12xf32> to vector<128x12xf32>
    %93 = arith.addf %90, %92 : vector<128x12xf32>
    %cst_82 = arith.constant 0.000000e+00 : f32
    %94 = vector.broadcast %cst_82 : f32 to vector<128x12xf32>
    %95 = arith.maximumf %93, %94 : vector<128x12xf32>
    %c1_83 = arith.constant 1 : index
    %c0_84 = arith.constant 0 : index
    %96 = vector.load %arg6[%c1_83, %c0_84] : memref<3x12xf32, #tpu.memory_space<vmem>>, vector<1x12xf32>
    %97 = vector.broadcast %96 : vector<1x12xf32> to vector<128x12xf32>
    %98 = arith.mulf %95, %97 : vector<128x12xf32>
    %c2_85 = arith.constant 2 : index
    %c0_86 = arith.constant 0 : index
    %99 = vector.load %arg6[%c2_85, %c0_86] : memref<3x12xf32, #tpu.memory_space<vmem>>, vector<1x12xf32>
    %100 = vector.broadcast %99 : vector<1x12xf32> to vector<128x12xf32>
    %101 = arith.addf %98, %100 : vector<128x12xf32>
    %cst_87 = arith.constant 0.000000e+00 : f32
    %102 = vector.broadcast %cst_87 : f32 to vector<128x12xf32>
    %103 = arith.maximumf %101, %102 : vector<128x12xf32>
    %104 = vector.shape_cast %103 : vector<128x12xf32> to vector<2x64x12xf32>
    %105 = vector.shape_cast %87 : vector<2x8x8x4xf32> to vector<2x64x4xf32>
    %106 = tpu.concatenate %104, %105 in 2 : vector<2x64x12xf32>, vector<2x64x4xf32> -> vector<2x64x16xf32>
    %c0_88 = arith.constant 0 : index
    %c0_89 = arith.constant 0 : index
    %c0_90 = arith.constant 0 : index
    %107 = vector.load %arg7[%c0_88, %c0_89, %c0_90] : memref<2x64x16xf32, #tpu.memory_space<vmem>>, vector<2x64x16xf32>
    tpu.vector_store %arg7[%c0_88, %c0_89, %c0_90], %106 {strides = array<i32>} : memref<2x64x16xf32, #tpu.memory_space<vmem>>, vector<2x64x16xf32>,
    return
  }
  func.func @transform_0(%arg0: i32) -> (i32, i32, i32, i32) {
    %c0_i32 = arith.constant 0 : i32
    %c0_i32_0 = arith.constant 0 : i32
    %c0_i32_1 = arith.constant 0 : i32
    %c0_i32_2 = arith.constant 0 : i32
    return %c0_i32, %arg0, %c0_i32_0, %c0_i32_1 : i32, i32, i32, i32
  }
  func.func @transform_1(%arg0: i32) -> (i32, i32) {
    %c0_i32 = arith.constant 0 : i32
    %c0_i32_0 = arith.constant 0 : i32
    %c0_i32_1 = arith.constant 0 : i32
    return %c0_i32, %c0_i32_0 : i32, i32
  }
  func.func @transform_2(%arg0: i32) -> (i32, i32) {
    %c0_i32 = arith.constant 0 : i32
    %c0_i32_0 = arith.constant 0 : i32
    %c0_i32_1 = arith.constant 0 : i32
    return %c0_i32, %c0_i32_0 : i32, i32
  }
  func.func @transform_3(%arg0: i32) -> (i32, i32) {
    %c0_i32 = arith.constant 0 : i32
    %c0_i32_0 = arith.constant 0 : i32
    %c0_i32_1 = arith.constant 0 : i32
    return %c0_i32, %c0_i32_0 : i32, i32
  }
  func.func @transform_4(%arg0: i32) -> (i32, i32) {
    %c0_i32 = arith.constant 0 : i32
    %c0_i32_0 = arith.constant 0 : i32
    %c0_i32_1 = arith.constant 0 : i32
    return %c0_i32, %c0_i32_0 : i32, i32
  }
  func.func @transform_5(%arg0: i32) -> (i32, i32) {
    %c0_i32 = arith.constant 0 : i32
    %c0_i32_0 = arith.constant 0 : i32
    %c0_i32_1 = arith.constant 0 : i32
    return %c0_i32, %c0_i32_0 : i32, i32
  }
  func.func @transform_6(%arg0: i32) -> (i32, i32, i32) {
    %c0_i32 = arith.constant 0 : i32
    %c0_i32_0 = arith.constant 0 : i32
    %c0_i32_1 = arith.constant 0 : i32
    return %arg0, %c0_i32, %c0_i32_0 : i32, i32, i32
  }
}

</mosaic_0001>

<bundles_post_ra>
// kernel: _lambda_.1
= control target key start
LH: loop header
LB: loop body
LE: loop exit
PB: predicated region body
PF: predicated region fallthrough
CT: control target
= control target key end

     0   :  { %11 = vsyncpa [#allocation5], 0  ;;  %s4592_s0 = inlined_call_operand.vmem [shape: f32[4,4,64,4], index: 0, kind: input, shape index: {}]   ;;  %s4593_s1 = inlined_call_operand.vmem [shape: f32[4,4], index: 1, kind: input, shape index: {}]   ;;  %s4594_s2 = inlined_call_operand.vmem [shape: f32[9,8], index: 2, kind: input, shape index: {}]   ;;  %s4595_s3 = inlined_call_operand.vmem [shape: f32[4,4], index: 3, kind: input, shape index: {}]   ;;  %s4596_s4 = inlined_call_operand.vmem [shape: f32[4,12], index: 4, kind: input, shape index: {}]   ;;  %s4597_s5 = inlined_call_operand.vmem [shape: f32[3,12], index: 5, kind: input, shape index: {}]   ;;  %s4598_s6 = inlined_call_operand.hbm [shape: f32[4,64,16], index: 6, kind: output, shape index: {}]  }
   0x1   :  { %13 = vsyncpa [#allocation5 + $0x1], 0  ;;  %s2826_s21 = smov 0   ;;  %s2828_s22 = smov 0  }
   0x2   :  { %s2830_s23 = smov 0   ;;  %s2832_s24 = smov 0  }
   0x3 LB: > { %s2543_s25 = sadd.s32 4294967295, %s2785_s24   ;;  %s2544_s26 = sadd.s32 4294967294, %s2785_s24   ;;  %s2785_s24 = sphi %s2832_s24, %s4617_s24   ;;  %s2781_s23 = sphi %s2830_s23, %s4616_s23   ;;  %s2777_s22 = sphi %s2828_s22, %s4615_s22   ;;  %s2773_s21 = sphi %s2826_s21, %s4614_s21  }
   0x4   : > { %s2849_s27 = sadd.s32 1, %s2785_s24   ;;  %s26_s28 = sadd.s32 1, %s2781_s23 }
   0x5   : > { %s23_s29 = ssub.s32 %s2785_s24, %s2849_s27  ;;  %p33_p0 = scmp.ne.s32.totalorder %s2781_s23, %s2777_s22 }
   0x6   : > { %p24_p1 = scmp.eq.s32.totalorder %s23_s29, 0  ;;  %p34_p2 = scmp.eq.s32.totalorder %s2785_s24, 0 }
   0x7   : > { %p168_p3 = scmp.eq.s32.totalorder %s2543_s25, 1  ;;  %p173_p4 = scmp.ne.s32.totalorder %s2777_s22, %s2773_s21 }
   0x8   : > { %s2862_s30 = scalar_select %p24_p1, %s2781_s23, %s26_s28  }
   0x9   : > { %p35_p5 = por %p34_p2, %p33_p0  ;;  %p2864_p6 = por %p168_p3, %p33_p0 }
   0xa   : > { %p174_p7 = scmp.eq.s32.totalorder %s2544_s26, 1  ;;  %p2546_p9 = scmp.ge.s32.totalorder %s2785_s24, 2 }
   0xc   : > { %p2868_p8 = por %p174_p7, %p173_p4  ;;  %205 = sbr.rel (%p2546_p9) target bundleno = 85 (0x55), region = 36 }
  0x11   : > { %208 = sbr.rel (!%p35_p5) target bundleno = 85 (0x55), region = 40  ;;  %s210_s9 = sand.u32 (%p35_p5), 1, %s2781_s23  }
  0x12   : > { %s2643_s10 = sshll.u32 (%p35_p5), %s2785_s24, 7  ;;  %s2547_s11 = sshll.u32 (%p35_p5), %s210_s9, 9 }
  0x13   : > { %s2880_s14 = scalar_lea.vmem (%p35_p5), %s4592_s0, %s2643_s10  ;;  %s2885_s15 = scalar_lea.vmem (%p35_p5), [#allocation3], %s2547_s11 }
  0x14   : > { %v371_v0 = vld [vmem:[%s2880_s14] sm:$0xff] (%p35_p5)  ;;  %v373_v1 = vld [vmem:[%s2880_s14 + $0x8] sm:$0xff] (%p35_p5)  ;;  %v375_v2 = vld [vmem:[%s2880_s14 + $0x10] sm:$0xff] (%p35_p5) }
  0x15   : > { %372 = vst [vmem:[%s2885_s15] sm:$0xff] (%p35_p5), %v371_v0  ;;  %v377_v3 = vld [vmem:[%s2880_s14 + $0x18] sm:$0xff] (%p35_p5)  ;;  %v379_v4 = vld [vmem:[%s2880_s14 + $0x20] sm:$0xff] (%p35_p5)  ;;  %v381_v5 = vld [vmem:[%s2880_s14 + $0x28] sm:$0xff] (%p35_p5) }
  0x16   : > { %374 = vst [vmem:[%s2885_s15 + $0x8] sm:$0xff] %v373_v1  ;;  %v383_v6 = vld [vmem:[%s2880_s14 + $0x30] sm:$0xff]  ;;  %v385_v7 = vld [vmem:[%s2880_s14 + $0x38] sm:$0xff]  ;;  %v387_v8 = vld [vmem:[%s2880_s14 + $0x40] sm:$0xff] }
  0x17   : > { %376 = vst [vmem:[%s2885_s15 + $0x10] sm:$0xff] %v375_v2  ;;  %v389_v9 = vld [vmem:[%s2880_s14 + $0x48] sm:$0xff]  ;;  %v391_v10 = vld [vmem:[%s2880_s14 + $0x50] sm:$0xff]  ;;  %v393_v11 = vld [vmem:[%s2880_s14 + $0x58] sm:$0xff] }
  0x18   : > { %378 = vst [vmem:[%s2885_s15 + $0x18] sm:$0xff] %v377_v3  ;;  %v395_v12 = vld [vmem:[%s2880_s14 + $0x60] sm:$0xff]  ;;  %v397_v13 = vld [vmem:[%s2880_s14 + $0x68] sm:$0xff]  ;;  %v399_v14 = vld [vmem:[%s2880_s14 + $0x70] sm:$0xff] }
  0x19   : > { %380 = vst [vmem:[%s2885_s15 + $0x20] sm:$0xff] %v379_v4  ;;  %v401_v15 = vld [vmem:[%s2880_s14 + $0x78] sm:$0xff]  ;;  %v403_v16 = vld [vmem:[%s2880_s14 + $0x100] sm:$0xff]  ;;  %v405_v17 = vld [vmem:[%s2880_s14 + $0x108] sm:$0xff] }
  0x1a   : > { %382 = vst [vmem:[%s2885_s15 + $0x28] sm:$0xff] %v381_v5  ;;  %v407_v18 = vld [vmem:[%s2880_s14 + $0x110] sm:$0xff]  ;;  %v409_v19 = vld [vmem:[%s2880_s14 + $0x118] sm:$0xff]  ;;  %v411_v20 = vld [vmem:[%s2880_s14 + $0x120] sm:$0xff] }
  0x1b   : > { %384 = vst [vmem:[%s2885_s15 + $0x30] sm:$0xff] %v383_v6  ;;  %v413_v21 = vld [vmem:[%s2880_s14 + $0x128] sm:$0xff]  ;;  %v415_v22 = vld [vmem:[%s2880_s14 + $0x130] sm:$0xff]  ;;  %v417_v23 = vld [vmem:[%s2880_s14 + $0x138] sm:$0xff] }
  0x1c   : > { %386 = vst [vmem:[%s2885_s15 + $0x38] sm:$0xff] %v385_v7  ;;  %v419_v24 = vld [vmem:[%s2880_s14 + $0x140] sm:$0xff]  ;;  %v421_v25 = vld [vmem:[%s2880_s14 + $0x148] sm:$0xff]  ;;  %v423_v26 = vld [vmem:[%s2880_s14 + $0x150] sm:$0xff] }
  0x1d   : > { %388 = vst [vmem:[%s2885_s15 + $0x40] sm:$0xff] %v387_v8  ;;  %v425_v27 = vld [vmem:[%s2880_s14 + $0x158] sm:$0xff]  ;;  %v427_v28 = vld [vmem:[%s2880_s14 + $0x160] sm:$0xff]  ;;  %v429_v29 = vld [vmem:[%s2880_s14 + $0x168] sm:$0xff] }
  0x1e   : > { %390 = vst [vmem:[%s2885_s15 + $0x48] sm:$0xff] %v389_v9  ;;  %v431_v30 = vld [vmem:[%s2880_s14 + $0x170] sm:$0xff]  ;;  %v433_v31 = vld [vmem:[%s2880_s14 + $0x178] sm:$0xff]  ;;  %v435_v32 = vld [vmem:[%s2880_s14 + $0x200] sm:$0xff] }
  0x1f   : > { %392 = vst [vmem:[%s2885_s15 + $0x50] sm:$0xff] %v391_v10  ;;  %v437_v33 = vld [vmem:[%s2880_s14 + $0x208] sm:$0xff]  ;;  %v439_v34 = vld [vmem:[%s2880_s14 + $0x210] sm:$0xff]  ;;  %v441_v35 = vld [vmem:[%s2880_s14 + $0x218] sm:$0xff] }
  0x20   : > { %394 = vst [vmem:[%s2885_s15 + $0x58] sm:$0xff] %v393_v11  ;;  %v443_v36 = vld [vmem:[%s2880_s14 + $0x220] sm:$0xff]  ;;  %v445_v37 = vld [vmem:[%s2880_s14 + $0x228] sm:$0xff]  ;;  %v447_v38 = vld [vmem:[%s2880_s14 + $0x230] sm:$0xff] }
  0x21   : > { %396 = vst [vmem:[%s2885_s15 + $0x60] sm:$0xff] %v395_v12  ;;  %v449_v39 = vld [vmem:[%s2880_s14 + $0x238] sm:$0xff]  ;;  %v451_v40 = vld [vmem:[%s2880_s14 + $0x240] sm:$0xff]  ;;  %v453_v41 = vld [vmem:[%s2880_s14 + $0x248] sm:$0xff] }
  0x22   : > { %398 = vst [vmem:[%s2885_s15 + $0x68] sm:$0xff] %v397_v13  ;;  %v455_v42 = vld [vmem:[%s2880_s14 + $0x250] sm:$0xff]  ;;  %v457_v43 = vld [vmem:[%s2880_s14 + $0x258] sm:$0xff]  ;;  %v459_v44 = vld [vmem:[%s2880_s14 + $0x260] sm:$0xff] }
  0x23   : > { %400 = vst [vmem:[%s2885_s15 + $0x70] sm:$0xff] %v399_v14  ;;  %v461_v45 = vld [vmem:[%s2880_s14 + $0x268] sm:$0xff]  ;;  %v463_v46 = vld [vmem:[%s2880_s14 + $0x270] sm:$0xff]  ;;  %v465_v47 = vld [vmem:[%s2880_s14 + $0x278] sm:$0xff] }
  0x24   : > { %402 = vst [vmem:[%s2885_s15 + $0x78] sm:$0xff] %v401_v15  ;;  %v467_v48 = vld [vmem:[%s2880_s14 + $0x300] sm:$0xff]  ;;  %v469_v49 = vld [vmem:[%s2880_s14 + $0x308] sm:$0xff]  ;;  %v471_v50 = vld [vmem:[%s2880_s14 + $0x310] sm:$0xff] }
  0x25   : > { %404 = vst [vmem:[%s2885_s15 + $0x80] sm:$0xff] %v403_v16  ;;  %v473_v51 = vld [vmem:[%s2880_s14 + $0x318] sm:$0xff]  ;;  %v475_v52 = vld [vmem:[%s2880_s14 + $0x320] sm:$0xff]  ;;  %v477_v53 = vld [vmem:[%s2880_s14 + $0x328] sm:$0xff] }
  0x26   : > { %406 = vst [vmem:[%s2885_s15 + $0x88] sm:$0xff] %v405_v17  ;;  %v479_v54 = vld [vmem:[%s2880_s14 + $0x330] sm:$0xff]  ;;  %v481_v55 = vld [vmem:[%s2880_s14 + $0x338] sm:$0xff]  ;;  %v483_v56 = vld [vmem:[%s2880_s14 + $0x340] sm:$0xff] }
  0x27   : > { %408 = vst [vmem:[%s2885_s15 + $0x90] sm:$0xff] %v407_v18  ;;  %v485_v57 = vld [vmem:[%s2880_s14 + $0x348] sm:$0xff]  ;;  %v487_v58 = vld [vmem:[%s2880_s14 + $0x350] sm:$0xff]  ;;  %v489_v59 = vld [vmem:[%s2880_s14 + $0x358] sm:$0xff] }
  0x28   : > { %410 = vst [vmem:[%s2885_s15 + $0x98] sm:$0xff] %v409_v19  ;;  %v491_v60 = vld [vmem:[%s2880_s14 + $0x360] sm:$0xff]  ;;  %v493_v61 = vld [vmem:[%s2880_s14 + $0x368] sm:$0xff]  ;;  %v495_v62 = vld [vmem:[%s2880_s14 + $0x370] sm:$0xff] }
  0x29   : > { %412 = vst [vmem:[%s2885_s15 + $0xa0] sm:$0xff] %v411_v20  ;;  %v497_v63 = vld [vmem:[%s2880_s14 + $0x378] sm:$0xff] }
  0x2a   : > { %414 = vst [vmem:[%s2885_s15 + $0xa8] sm:$0xff] %v413_v21 }
  0x2b   : > { %416 = vst [vmem:[%s2885_s15 + $0xb0] sm:$0xff] %v415_v22 }
  0x2c   : > { %418 = vst [vmem:[%s2885_s15 + $0xb8] sm:$0xff] %v417_v23 }
  0x2d   : > { %420 = vst [vmem:[%s2885_s15 + $0xc0] sm:$0xff] %v419_v24 }
  0x2e   : > { %422 = vst [vmem:[%s2885_s15 + $0xc8] sm:$0xff] %v421_v25 }
  0x2f   : > { %424 = vst [vmem:[%s2885_s15 + $0xd0] sm:$0xff] %v423_v26 }
  0x30   : > { %426 = vst [vmem:[%s2885_s15 + $0xd8] sm:$0xff] %v425_v27 }
  0x31   : > { %428 = vst [vmem:[%s2885_s15 + $0xe0] sm:$0xff] %v427_v28 }
  0x32   : > { %430 = vst [vmem:[%s2885_s15 + $0xe8] sm:$0xff] %v429_v29 }
  0x33   : > { %432 = vst [vmem:[%s2885_s15 + $0xf0] sm:$0xff] %v431_v30 }
  0x34   : > { %434 = vst [vmem:[%s2885_s15 + $0xf8] sm:$0xff] %v433_v31 }
  0x35   : > { %436 = vst [vmem:[%s2885_s15 + $0x100] sm:$0xff] %v435_v32 }
  0x36   : > { %438 = vst [vmem:[%s2885_s15 + $0x108] sm:$0xff] %v437_v33 }
  0x37   : > { %440 = vst [vmem:[%s2885_s15 + $0x110] sm:$0xff] %v439_v34 }
  0x38   : > { %442 = vst [vmem:[%s2885_s15 + $0x118] sm:$0xff] %v441_v35 }
  0x39   : > { %444 = vst [vmem:[%s2885_s15 + $0x120] sm:$0xff] %v443_v36 }
  0x3a   : > { %446 = vst [vmem:[%s2885_s15 + $0x128] sm:$0xff] %v445_v37 }
  0x3b   : > { %448 = vst [vmem:[%s2885_s15 + $0x130] sm:$0xff] %v447_v38 }
  0x3c   : > { %450 = vst [vmem:[%s2885_s15 + $0x138] sm:$0xff] %v449_v39 }
  0x3d   : > { %452 = vst [vmem:[%s2885_s15 + $0x140] sm:$0xff] %v451_v40 }
  0x3e   : > { %454 = vst [vmem:[%s2885_s15 + $0x148] sm:$0xff] %v453_v41 }
  0x3f   : > { %456 = vst [vmem:[%s2885_s15 + $0x150] sm:$0xff] %v455_v42 }
  0x40   : > { %458 = vst [vmem:[%s2885_s15 + $0x158] sm:$0xff] %v457_v43 }
  0x41   : > { %460 = vst [vmem:[%s2885_s15 + $0x160] sm:$0xff] %v459_v44 }
  0x42   : > { %462 = vst [vmem:[%s2885_s15 + $0x168] sm:$0xff] %v461_v45 }
  0x43   : > { %464 = vst [vmem:[%s2885_s15 + $0x170] sm:$0xff] %v463_v46 }
  0x44   : > { %466 = vst [vmem:[%s2885_s15 + $0x178] sm:$0xff] %v465_v47 }
  0x45   : > { %468 = vst [vmem:[%s2885_s15 + $0x180] sm:$0xff] %v467_v48 }
  0x46   : > { %470 = vst [vmem:[%s2885_s15 + $0x188] sm:$0xff] %v469_v49 }
  0x47   : > { %472 = vst [vmem:[%s2885_s15 + $0x190] sm:$0xff] %v471_v50 }
  0x48   : > { %474 = vst [vmem:[%s2885_s15 + $0x198] sm:$0xff] %v473_v51 }
  0x49   : > { %476 = vst [vmem:[%s2885_s15 + $0x1a0] sm:$0xff] %v475_v52 }
  0x4a   : > { %478 = vst [vmem:[%s2885_s15 + $0x1a8] sm:$0xff] %v477_v53 }
  0x4b   : > { %480 = vst [vmem:[%s2885_s15 + $0x1b0] sm:$0xff] %v479_v54 }
  0x4c   : > { %482 = vst [vmem:[%s2885_s15 + $0x1b8] sm:$0xff] %v481_v55 }
  0x4d   : > { %484 = vst [vmem:[%s2885_s15 + $0x1c0] sm:$0xff] %v483_v56 }
  0x4e   : > { %486 = vst [vmem:[%s2885_s15 + $0x1c8] sm:$0xff] %v485_v57 }
  0x4f   : > { %488 = vst [vmem:[%s2885_s15 + $0x1d0] sm:$0xff] %v487_v58 }
  0x50   : > { %490 = vst [vmem:[%s2885_s15 + $0x1d8] sm:$0xff] %v489_v59 }
  0x51   : > { %492 = vst [vmem:[%s2885_s15 + $0x1e0] sm:$0xff] %v491_v60 }
  0x52   : > { %494 = vst [vmem:[%s2885_s15 + $0x1e8] sm:$0xff] %v493_v61 }
  0x53   : > { %496 = vst [vmem:[%s2885_s15 + $0x1f0] sm:$0xff] %v495_v62 }
  0x54   : > { %498 = vst [vmem:[%s2885_s15 + $0x1f8] sm:$0xff] %v497_v63 }
  0x55 PF: > { %p2551_p10 = scmp.ge.s32.totalorder %s2785_s24, 1  ;;  %p503_p11 = scmp.lt.s32.totalorder %s2785_s24, 3 }
  0x57   : > { %p504_p12 = pnand %p2551_p10, %p503_p11 }
  0x59   : > { %507 = sbr.rel (%p504_p12) target bundleno = 686 (0x2ae), region = 78 }
  0x5e   : > { %v695_v0 = vld [vmem:[%s4593_s1] sm:$0xf]  ;;  %vm891_vm0 = vcmask 1043456   ;;  %s3018_s18 = sand.u32 1, %s2777_s22   ;;  %vm698_vm1 = vcmask 31744   ;;  %s2787_s26 = smov 4  }
  0x5f   : > { %2554 = vmatpush.msk.msra.mxu0 %vm891_vm0, %v695_v0  ;;  %2647 = vmatpush.msk.msra.mxu2 %vm891_vm0, %v695_v0  ;;  %s2552_s19 = sshll.u32 %s3018_s18, 9  ;;  %vm541_vm2 = vcmask 64512   ;;  %vm543_vm3 = vcmask 57344   ;;  %s2789_s11 = smov 8   ;;  %vm2425_vm4 = vcmask 97280   ;;  %vm2442_vm5 = vcmask 130048  }
  0x60   : > { %2648 = vmatpush.msk.msra.mxu3 %vm891_vm0, %v695_v0  ;;  %2646 = vmatpush.msk.msra.mxu1 %vm891_vm0, %v695_v0  ;;  %s3025_s20 = scalar_lea.vmem [#allocation3], %s2552_s19  ;;  %s2553_s12 = sshll.u32 %s3018_s18, 7 }
  0x61   : > { %v3028_v1 = vld [vmem:[%s3025_s20 + $0x160] sm:$0xff]  ;;  %v3050_v6 = vld [vmem:[%s3025_s20 + $0x88] sm:$0xff]  ;;  %v3073_v12 = vld [vmem:[%s3025_s20 + $0x170] sm:$0xff]  ;;  %s4461_s13 = scalar_lea.vmem [#allocation4], %s2553_s12  ;;  %s2645_s14 = sshll.u32 %s2543_s25, 7 }
  0x62   : > { %v3031_v2 = vld [vmem:[%s3025_s20 + $0x100] sm:$0xff]  ;;  %2599 = vmatmul.msk.f32.vlgmr.msra.gmra.mxu3 %vm698_vm1, %v3028_v1  ;;  %1398 = vrot.lane.b32.xlu2 %v3050_v6, %s2787_s26  ;;  %v3055_v7 = vld [vmem:[%s3025_s20 + $0x168] sm:$0xff]  ;;  %v3077_v14 = vld [vmem:[%s3025_s20 + $0xd0] sm:$0xff]  ;;  %s2472_s17 = scalar_lea.hbm %s4598_s6, %s2645_s14  ;;  %s2473_s19 = sshll.u32 %s4461_s13, 4  ;;  %s2474_s19 = int_to_ptr.vmem [resolvable:$true] %s2473_s19 }
  0x63   : > { %v3034_v3 = vld [vmem:[%s3025_s20 + $0xc0] sm:$0xff]  ;;  %1428 = vrot.lane.b32.xlu1 %v3031_v2, %s2787_s26  ;;  %v3059_v9 = vld [vmem:[%s3025_s20 + $0xc8] sm:$0xff]  ;;  %v633_v16 = vld [vmem:[%s3025_s20 + $0x10] sm:$0xff]  ;;  %s2460_s25 = scalar_lea.sflag [#allocation5], %s3018_s18  ;;  %s2743_s10 = scalar_lea.hbm %s4598_s6, 256 }
  0x64   : > { %v3041_v4 = vld [vmem:[%s3025_s20 + $0x80] sm:$0xff]  ;;  %2579 = vmatmul.msk.f32.vlgmr.msra.gmra.mxu2 %vm698_vm1, %v3034_v3  ;;  %v632_v10 = vld [vmem:[%s3025_s20 + $0x8] sm:$0xff]  ;;  %v3087_v17 = vld [vmem:[%s3025_s20 + $0x90] sm:$0xff] }
  0x65   : > { %v631_v5 = vld [vmem:[%s3025_s20] sm:$0xff]  ;;  %1396 = vrot.lane.b32.xlu0 %v3041_v4, %s2787_s26  ;;  %v680_v13 = vld [vmem:[%s3025_s20 + $0x188] sm:$0xff]  ;;  %v3097_v18 = vld [vmem:[%s3025_s20 + $0x178] sm:$0xff] }
  0x66   : > { %2555 = vmatmul.msk.f32.vlgmr.msra.gmra.mxu0 %vm698_vm1, %v631_v5  ;;  %v679_v8 = vld [vmem:[%s3025_s20 + $0x180] sm:$0xff]  ;;  %v3080_v15 = vld [vmem:[%s3025_s20 + $0x108] sm:$0xff]  ;;  %v3100_v19 = vld [vmem:[%s3025_s20 + $0x110] sm:$0xff] }
  0x67   : > { %v651_v11 = vld [vmem:[%s3025_s20 + $0xa0] sm:$0xff]  ;;  %v3103_v20 = vld [vmem:[%s3025_s20 + $0xd8] sm:$0xff]  ;;  %v681_v22 = vld [vmem:[%s3025_s20 + $0x190] sm:$0xff] }
  0x68   : > { %2575 = vmatmul.msk.f32.vlgmr.msra.gmra.mxu1 %vm698_vm1, %v651_v11  ;;  %v634_v21 = vld [vmem:[%s3025_s20 + $0x18] sm:$0xff]  ;;  %v652_v23 = vld [vmem:[%s3025_s20 + $0xa8] sm:$0xff]  ;;  %v3119_v24 = vld [vmem:[%s3025_s20 + $0xe0] sm:$0xff] }
  0x69   : > { %v3122_v25 = vld [vmem:[%s3025_s20 + $0x98] sm:$0xff]  ;;  %v635_v26 = vld [vmem:[%s3025_s20 + $0x20] sm:$0xff]  ;;  %v653_v28 = vld [vmem:[%s3025_s20 + $0xb0] sm:$0xff] }
  0x6a   : > { %2600 = vmatmul.msk.f32.gmra.mxu3 %vm698_vm1, %v3055_v7  ;;  %1366 = vrot.lane.b32.xlu2 %v632_v10, %s2787_s26  ;;  %v3128_v27 = vld [vmem:[%s3025_s20 + $0x118] sm:$0xff]  ;;  %v3140_v29 = vld [vmem:[%s3025_s20 + $0xe8] sm:$0xff]  ;;  %v683_v33 = vld [vmem:[%s3025_s20 + $0x1a0] sm:$0xff] }
  0x6b   : > { %1460 = vrot.lane.b32.xlu1 %v679_v8, %s2787_s26  ;;  %v682_v30 = vld [vmem:[%s3025_s20 + $0x198] sm:$0xff]  ;;  %v636_v31 = vld [vmem:[%s3025_s20 + $0x28] sm:$0xff]  ;;  %v3155_v34 = vld [vmem:[%s3025_s20 + $0xf0] sm:$0xff] }
  0x6c   : > { %2580 = vmatmul.msk.f32.gmra.mxu2 %vm698_vm1, %v3059_v9  ;;  %v654_v32 = vld [vmem:[%s3025_s20 + $0xb8] sm:$0xff]  ;;  %v667_v35 = vld [vmem:[%s3025_s20 + $0x120] sm:$0xff]  ;;  %v637_v36 = vld [vmem:[%s3025_s20 + $0x30] sm:$0xff] }
  0x6d   : > { %1364 = vrot.lane.b32.xlu0 %v631_v5, %s2787_s26  ;;  %v668_v37 = vld [vmem:[%s3025_s20 + $0x128] sm:$0xff]  ;;  %v3168_v38 = vld [vmem:[%s3025_s20 + $0xf8] sm:$0xff]  ;;  %v639_v41 = vld [vmem:[%s3025_s20 + $0x40] sm:$0xff] }
  0x6e   : > { %2556 = vmatmul.msk.f32.gmra.mxu0 %vm698_vm1, %v632_v10  ;;  %v638_v39 = vld [vmem:[%s3025_s20 + $0x38] sm:$0xff]  ;;  %v684_v40 = vld [vmem:[%s3025_s20 + $0x1a8] sm:$0xff]  ;;  %v669_v42 = vld [vmem:[%s3025_s20 + $0x130] sm:$0xff] }
  0x6f   : > { %v685_v43 = vld [vmem:[%s3025_s20 + $0x1b0] sm:$0xff]  ;;  %v640_v44 = vld [vmem:[%s3025_s20 + $0x48] sm:$0xff]  ;;  %v686_v45 = vld [vmem:[%s3025_s20 + $0x1b8] sm:$0xff] }
  0x70   : > { %2576 = vmatmul.msk.f32.gmra.mxu1 %vm698_vm1, %v652_v23  ;;  %v641_v46 = vld [vmem:[%s3025_s20 + $0x50] sm:$0xff]  ;;  %v670_v47 = vld [vmem:[%s3025_s20 + $0x138] sm:$0xff]  ;;  %v671_v48 = vld [vmem:[%s3025_s20 + $0x140] sm:$0xff] }
  0x71   : > { %v642_v49 = vld [vmem:[%s3025_s20 + $0x58] sm:$0xff]  ;;  %v687_v50 = vld [vmem:[%s3025_s20 + $0x1c0] sm:$0xff]  ;;  %v3224_v53 = vld [vmem:[%s3025_s20 + $0x148] sm:$0xff] }
  0x72   : > { %2601 = vmatmul.msk.f32.gmra.mxu3 %vm698_vm1, %v3073_v12  ;;  %1400 = vrot.lane.b32.xlu2 %v3087_v17, %s2787_s26  ;;  %v643_v52 = vld [vmem:[%s3025_s20 + $0x60] sm:$0xff]  ;;  %v688_v54 = vld [vmem:[%s3025_s20 + $0x1c8] sm:$0xff]  ;;  %v689_v57 = vld [vmem:[%s3025_s20 + $0x1d0] sm:$0xff] }
  0x73   : > { %1462 = vrot.lane.b32.xlu1 %v680_v13, %s2787_s26  ;;  %v3236_v56 = vld [vmem:[%s3025_s20 + $0x68] sm:$0xff]  ;;  %v3250_v59 = vld [vmem:[%s3025_s20 + $0x150] sm:$0xff]  ;;  %v690_v63 = vld [vmem:[%s3025_s20 + $0x1d8] sm:$0xff] }
  0x74   : > { %2581 = vmatmul.msk.f32.gmra.mxu2 %vm698_vm1, %v3077_v14  ;;  %v3253_v60 = vld [vmem:[%s3025_s20 + $0x70] sm:$0xff]  ;;  %v3270_v0 = vld [vmem:[%s3025_s20 + $0x158] sm:$0xff]  ;;  %v691_v10 = vld [vmem:[%s3025_s20 + $0x1e0] sm:$0xff] }
  0x75   : > { %1430 = vrot.lane.b32.xlu0 %v3080_v15, %s2787_s26 }
  0x76   : > { %2557 = vmatmul.msk.f32.gmra.mxu0 %vm698_vm1, %v633_v16 }
  0x78   : > { %2577 = vmatmul.msk.f32.gmra.mxu1 %vm698_vm1, %v653_v28 }
  0x7a   : > { %2602 = vmatmul.msk.f32.gmra.mxu3 %vm698_vm1, %v3097_v18  ;;  %1464 = vrot.lane.b32.xlu2 %v681_v22, %s2787_s26 }
  0x7b   : > { %1432 = vrot.lane.b32.xlu1 %v3100_v19, %s2787_s26 }
  0x7c   : > { %2582 = vmatmul.msk.f32.gmra.mxu2 %vm698_vm1, %v3103_v20 }
  0x7d   : > { %1368 = vrot.lane.b32.xlu0 %v633_v16, %s2787_s26 }
  0x7e   : > { %2558 = vmatmul.msk.f32.gmra.mxu0 %vm698_vm1, %v634_v21 }
  0x80   : > { %2578 = vmatmul.msk.f32.gmra.mxu1 %vm698_vm1, %v654_v32 }
  0x82   : > { %2603 = vmatmul.msk.f32.gmra.mxu3 %vm698_vm1, %v679_v8  ;;  %1434 = vrot.lane.b32.xlu2 %v3128_v27, %s2787_s26 }
  0x83   : > { %1370 = vrot.lane.b32.xlu1 %v634_v21, %s2787_s26 }
  0x84   : > { %2583 = vmatmul.msk.f32.gmra.mxu2 %vm698_vm1, %v3119_v24 }
  0x85   : > { %1402 = vrot.lane.b32.xlu0 %v3122_v25, %s2787_s26 }
  0x86   : > { %2559 = vmatmul.msk.f32.gmra.mxu0 %vm698_vm1, %v635_v26 }
  0x8a   : > { %2604 = vmatmul.msk.f32.gmra.mxu3 %vm698_vm1, %v680_v13  ;;  %1372 = vrot.lane.b32.xlu2 %v635_v26, %s2787_s26  ;;  %v692_v26 = vld [vmem:[%s3025_s20 + $0x1e8] sm:$0xff] }
  0x8b   : > { %1404 = vrot.lane.b32.xlu1 %v651_v11, %s2787_s26 }
  0x8c   : > { %2584 = vmatmul.msk.f32.gmra.mxu2 %vm698_vm1, %v3140_v29 }
  0x8d   : > { %1466 = vrot.lane.b32.xlu0 %v682_v30, %s2787_s26 }
  0x8e   : > { %2560 = vmatmul.msk.f32.gmra.mxu0 %vm698_vm1, %v636_v31 }
  0x92   : > { %2605 = vmatmul.msk.f32.gmra.mxu3 %vm698_vm1, %v681_v22  ;;  %1406 = vrot.lane.b32.xlu2 %v652_v23, %s2787_s26 }
  0x93   : > { %1468 = vrot.lane.b32.xlu1 %v683_v33, %s2787_s26 }
  0x94   : > { %2585 = vmatmul.msk.f32.gmra.mxu2 %vm698_vm1, %v3155_v34 }
  0x95   : > { %1436 = vrot.lane.b32.xlu0 %v667_v35, %s2787_s26 }
  0x96   : > { %2561 = vmatmul.msk.f32.gmra.mxu0 %vm698_vm1, %v637_v36 }
  0x9a   : > { %2606 = vmatmul.msk.f32.gmra.mxu3 %vm698_vm1, %v682_v30  ;;  %1470 = vrot.lane.b32.xlu2 %v684_v40, %s2787_s26 }
  0x9b   : > { %1438 = vrot.lane.b32.xlu1 %v668_v37, %s2787_s26 }
  0x9c   : > { %2586 = vmatmul.msk.f32.gmra.mxu2 %vm698_vm1, %v3168_v38 }
  0x9d   : > { %1374 = vrot.lane.b32.xlu0 %v636_v31, %s2787_s26 }
  0x9e   : > { %2562 = vmatmul.msk.f32.gmra.mxu0 %vm698_vm1, %v638_v39 }
  0xa2   : > { %2607 = vmatmul.msk.f32.gmra.mxu3 %vm698_vm1, %v683_v33  ;;  %1440 = vrot.lane.b32.xlu2 %v669_v42, %s2787_s26 }
  0xa3   : > { %1376 = vrot.lane.b32.xlu1 %v637_v36, %s2787_s26 }
  0xa4   : > { %2587 = vmatmul.msk.f32.gmra.mxu2 %vm698_vm1, %v3031_v2 }
  0xa5   : > { %1408 = vrot.lane.b32.xlu0 %v653_v28, %s2787_s26 }
  0xa6   : > { %2563 = vmatmul.msk.f32.gmra.mxu0 %vm698_vm1, %v639_v41 }
  0xaa   : > { %2608 = vmatmul.msk.f32.gmra.mxu3 %vm698_vm1, %v684_v40  ;;  %1378 = vrot.lane.b32.xlu2 %v638_v39, %s2787_s26  ;;  %v693_v39 = vld [vmem:[%s3025_s20 + $0x1f0] sm:$0xff] }
  0xab   : > { %1410 = vrot.lane.b32.xlu1 %v654_v32, %s2787_s26 }
  0xac   : > { %2588 = vmatmul.msk.f32.gmra.mxu2 %vm698_vm1, %v3080_v15  ;;  %v3299_v15 = vld [vmem:[%s4595_s3 + $0x1] ss:$0 sm:$0xff] }
  0xad   : > { %1472 = vrot.lane.b32.xlu0 %v685_v43, %s2787_s26 }
  0xae   : > { %2564 = vmatmul.msk.f32.gmra.mxu0 %vm698_vm1, %v640_v44 }
  0xb2   : > { %2609 = vmatmul.msk.f32.gmra.mxu3 %vm698_vm1, %v685_v43  ;;  %1442 = vrot.lane.b32.xlu2 %v670_v47, %s2787_s26 }
  0xb3   : > { %1412 = vrot.lane.b32.xlu1 %v3034_v3, %s2787_s26  ;;  %v3275_v3 = vld [vmem:[%s3025_s20 + $0x78] sm:$0xff] }
  0xb4   : > { %2589 = vmatmul.msk.f32.gmra.mxu2 %vm698_vm1, %v3100_v19  ;;  %v3309_v19 = vld [vmem:[%s4595_s3 + $0x2] ss:$0 sm:$0xff] }
  0xb5   : > { %1474 = vrot.lane.b32.xlu0 %v686_v45, %s2787_s26 }
  0xb6   : > { %2565 = vmatmul.msk.f32.gmra.mxu0 %vm698_vm1, %v641_v46 }
  0xba   : > { %2610 = vmatmul.msk.f32.gmra.mxu3 %vm698_vm1, %v686_v45  ;;  %1476 = vrot.lane.b32.xlu2 %v687_v50, %s2787_s26 }
  0xbb   : > { %1444 = vrot.lane.b32.xlu1 %v671_v48, %s2787_s26 }
  0xbc   : > { %2590 = vmatmul.msk.f32.gmra.mxu2 %vm698_vm1, %v3128_v27  ;;  %v3218_v51 = vpop.permute.xlu2 %1398 }
  0xbd   : > { %1380 = vrot.lane.b32.xlu0 %v639_v41, %s2787_s26 }
  0xbe   : > { %2566 = vmatmul.msk.f32.gmra.mxu0 %vm698_vm1, %v642_v49 }
  0xc2   : > { %2611 = vmatmul.msk.f32.gmra.mxu3 %vm698_vm1, %v687_v50  ;;  %1446 = vrot.lane.b32.xlu2 %v3224_v53, %s2787_s26  ;;  %v694_v50 = vld [vmem:[%s3025_s20 + $0x1f8] sm:$0xff]  ;;  %s2475_s20 = sshll.u32 %s2472_s17, 4  ;;  %s2476_s20 = int_to_ptr.hbm [resolvable:$true] %s2475_s20 }
  0xc3   : > { %1382 = vrot.lane.b32.xlu1 %v640_v44, %s2787_s26 }
  0xc4   : > { %2591 = vmatmul.msk.f32.gmra.mxu2 %vm698_vm1, %v667_v35  ;;  %v3233_v55 = vpop.permute.xlu2 %1366 }
  0xc5   : > { %1414 = vrot.lane.b32.xlu0 %v3059_v9, %s2787_s26  ;;  %v3290_v9 = vld [vmem:[%s4595_s3] ss:$0 sm:$0xff] }
  0xc6   : > { %2567 = vmatmul.msk.f32.gmra.mxu0 %vm698_vm1, %v643_v52 }
  0xca   : > { %2612 = vmatmul.msk.f32.gmra.mxu3 %vm698_vm1, %v688_v54  ;;  %1384 = vrot.lane.b32.xlu2 %v641_v46, %s2787_s26 }
  0xcb   : > { %1416 = vrot.lane.b32.xlu1 %v3077_v14, %s2787_s26 }
  0xcc   : > { %2592 = vmatmul.msk.f32.gmra.mxu2 %vm698_vm1, %v668_v37  ;;  %v3247_v58 = vpop.permute.xlu2 %1400 }
  0xcd   : > { %1478 = vrot.lane.b32.xlu0 %v688_v54, %s2787_s26 }
  0xce   : > { %2568 = vmatmul.msk.f32.gmra.mxu0 %vm698_vm1, %v3236_v56 }
  0xd2   : > { %2613 = vmatmul.msk.f32.gmra.mxu3 %vm698_vm1, %v689_v57  ;;  %1418 = vrot.lane.b32.xlu2 %v3103_v20, %s2787_s26 }
  0xd3   : > { %1480 = vrot.lane.b32.xlu1 %v689_v57, %s2787_s26 }
  0xd4   : > { %2593 = vmatmul.msk.f32.gmra.mxu2 %vm698_vm1, %v669_v42  ;;  %v3272_v2 = vpop.permute.xlu2 %1464 }
  0xd5   : > { %1448 = vrot.lane.b32.xlu0 %v3250_v59, %s2787_s26  ;;  %v3262_v61 = vpop.permute.xlu1 %1428 }
  0xd6   : > { %2569 = vmatmul.msk.f32.gmra.mxu0 %vm698_vm1, %v3253_v60 }
  0xd7   : > { %v3264_v62 = vpop.permute.xlu0 %1396 }
  0xda   : > { %2614 = vmatmul.msk.f32.gmra.mxu3 %vm698_vm1, %v690_v63  ;;  %1482 = vrot.lane.b32.xlu2 %v690_v63, %s2787_s26 }
  0xdb   : > { %1450 = vrot.lane.b32.xlu1 %v3270_v0, %s2787_s26 }
  0xdc   : > { %2594 = vmatmul.msk.f32.gmra.mxu2 %vm698_vm1, %v670_v47  ;;  %v3293_v11 = vpop.permute.xlu2 %1434 }
  0xdd   : > { %1386 = vrot.lane.b32.xlu0 %v642_v49, %s2787_s26  ;;  %v3284_v5 = vpop.permute.xlu1 %1460 }
  0xde   : > { %2570 = vmatmul.msk.f32.gmra.mxu0 %vm698_vm1, %v3275_v3 }
  0xdf   : > { %v1365_v8 = vpop.permute.xlu0 %1364 }
  0xe2   : > { %2615 = vmatmul.msk.f32.gmra.mxu3 %vm698_vm1, %v691_v10  ;;  %1452 = vrot.lane.b32.xlu2 %v3028_v1, %s2787_s26 }
  0xe3   : > { %v912_v13 = vpop.f32.mrf.mxu0  ;;  %1388 = vrot.lane.b32.xlu1 %v643_v52, %s2787_s26 }
  0xe4   : > { %v913_v14 = vadd.f32 %v3290_v9, %v912_v13  ;;  %2595 = vmatmul.msk.f32.gmra.mxu2 %vm698_vm1, %v671_v48  ;;  %v3325_v27 = vpop.permute.xlu2 %1372 }
  0xe5   : > { %1420 = vrot.lane.b32.xlu0 %v3119_v24, %s2787_s26  ;;  %v3313_v20 = vpop.permute.xlu1 %1462  ;;  %v3317_v22 = vpop.f32.mrf.mxu3 }
  0xe6   : > { %v1104_v16 = vmax.f32 %v913_v14, 0.0  ;;  %2571 = vmatmul.msk.f32.gmra.mxu0 %vm698_vm1, %v3041_v4 }
  0xe7   : > { %v3315_v21 = vpop.permute.xlu0 %1430  ;;  %v3322_v24 = vpop.f32.mrf.mxu2 }
  0xe8   : > { %v1170_v23 = vmul.f32 %v3299_v15, %v1104_v16 }
  0xea   : > { %v1236_v28 = vadd.f32 %v3309_v19, %v1170_v23  ;;  %2616 = vmatmul.msk.f32.gmra.mxu3 %vm698_vm1, %v692_v26  ;;  %1390 = vrot.lane.b32.xlu2 %v3236_v56, %s2787_s26 }
  0xeb   : > { %v915_v30 = vpop.f32.mrf.mxu0  ;;  %1422 = vrot.lane.b32.xlu1 %v3140_v29, %s2787_s26 }
  0xec   : > { %v1300_v4 = vmax.f32 %v1236_v28, 0.0  ;;  %v916_v31 = vadd.f32 %v3290_v9, %v915_v30  ;;  %2596 = vmatmul.msk.f32.gmra.mxu2 %vm698_vm1, %v3224_v53  ;;  %v3349_v40 = vpop.permute.xlu2 %1406 }
  0xed   : > { %1484 = vrot.lane.b32.xlu0 %v691_v10, %s2787_s26  ;;  %v3338_v33 = vpop.permute.xlu1 %1432  ;;  %v3341_v36 = vpop.f32.mrf.mxu3 }
  0xee   : > { %v1556_v1 = vsel %vm698_vm1, %v1300_v4, %v1365_v8  ;;  %v1105_v32 = vmax.f32 %v916_v31, 0.0  ;;  %2572 = vmatmul.msk.f32.gmra.mxu0 %vm698_vm1, %v3050_v6 }
  0xef   : > { %1621 = vst.msk [vmem:[#allocation2 + $0x11] sm:$0xff] %vm541_vm2, %v1556_v1  ;;  %v1369_v35 = vpop.permute.xlu0 %1368  ;;  %v3346_v37 = vpop.f32.mrf.mxu2 }
  0xf0   : > { %v1171_v29 = vmul.f32 %v3299_v15, %v1105_v32 }
  0xf2   : > { %v1237_v41 = vadd.f32 %v3309_v19, %v1171_v29  ;;  %2617 = vmatmul.msk.f32.gmra.mxu3 %vm698_vm1, %v693_v39  ;;  %1424 = vrot.lane.b32.xlu2 %v3155_v34, %s2787_s26 }
  0xf3   : > { %v918_v6 = vpop.f32.mrf.mxu0  ;;  %1486 = vrot.lane.b32.xlu1 %v692_v26, %s2787_s26 }
  0xf4   : > { %v1301_v42 = vmax.f32 %v1237_v41, 0.0  ;;  %v919_v43 = vadd.f32 %v3290_v9, %v918_v6  ;;  %2597 = vmatmul.msk.f32.gmra.mxu2 %vm698_vm1, %v3250_v59  ;;  %v3374_v52 = vpop.permute.xlu2 %1470  ;;  %v2788_v41 = vmov 0.0  }
  0xf5   : > { %1454 = vrot.lane.b32.xlu0 %v3055_v7, %s2787_s26  ;;  %v1371_v46 = vpop.permute.xlu1 %1370  ;;  %v3366_v48 = vpop.f32.mrf.mxu3  ;;  %582 = vst.msk [vmem:[#allocation2 + $0x170] sm:$0x1] %vm543_vm3, %v2788_v41 }
  0xf6   : > { %v1557_v44 = vsel %vm698_vm1, %v1301_v42, %v3233_v55  ;;  %v1106_v45 = vmax.f32 %v919_v43, 0.0  ;;  %2573 = vmatmul.msk.f32.gmra.mxu0 %vm698_vm1, %v3087_v17  ;;  %617 = vst.msk [vmem:[#allocation2 + $0x3a0] sm:$0x1] %vm543_vm3, %v2788_v41 }
  0xf7   : > { %1622 = vst.msk [vmem:[#allocation2 + $0x21] sm:$0xff] %vm541_vm2, %v1557_v44  ;;  %v3364_v47 = vpop.permute.xlu0 %1402  ;;  %v3371_v7 = vpop.f32.mrf.mxu2 }
  0xf8   : > { %v1172_v49 = vmul.f32 %v3299_v15, %v1106_v45  ;;  %618 = vst.msk [vmem:[#allocation2 + $0x3b0] sm:$0x1] %vm543_vm3, %v2788_v41 }
  0xf9   : > { %551 = vst.msk [vmem:[#allocation2 + $0x240] sm:$0xff] %vm541_vm2, %v2788_v41 }
  0xfa   : > { %v1238_v53 = vadd.f32 %v3309_v19, %v1172_v49  ;;  %2618 = vmatmul.msk.f32.gmra.mxu3 %vm698_vm1, %v694_v50  ;;  %1488 = vrot.lane.b32.xlu2 %v693_v39, %s2787_s26  ;;  %552 = vst.msk [vmem:[#allocation2 + $0x248] sm:$0x1] %vm543_vm3, %v2788_v41 }
  0xfb   : > { %v921_v17 = vpop.f32.mrf.mxu0  ;;  %1456 = vrot.lane.b32.xlu1 %v3073_v12, %s2787_s26  ;;  %553 = vst.msk [vmem:[#allocation2 + $0x2d0] sm:$0xff] %vm541_vm2, %v2788_v41 }
  0xfc   : > { %v1302_v54 = vmax.f32 %v1238_v53, 0.0  ;;  %v922_v55 = vadd.f32 %v3290_v9, %v921_v17  ;;  %2598 = vmatmul.msk.f32.gmra.mxu2 %vm698_vm1, %v3270_v0  ;;  %554 = vst.msk [vmem:[#allocation2 + $0x2d8] sm:$0x1] %vm543_vm3, %v2788_v41 }
  0xfd   : > { %1392 = vrot.lane.b32.xlu0 %v3253_v60, %s2787_s26  ;;  %v3388_v57 = vpop.permute.xlu1 %1404  ;;  %v3393_v12 = vpop.f32.mrf.mxu3  ;;  %555 = vst.msk [vmem:[#allocation2 + $0x360] sm:$0xff] %vm541_vm2, %v2788_v41 }
  0xfe   : > { %v1558_v34 = vsel %vm698_vm1, %v1302_v54, %v1369_v35  ;;  %v1107_v56 = vmax.f32 %v922_v55, 0.0  ;;  %2574 = vmatmul.msk.f32.gmra.mxu0 %vm698_vm1, %v3122_v25  ;;  %v3399_v60 = vpop.permute.xlu2 %1440  ;;  %556 = vst.msk [vmem:[#allocation2 + $0x368] sm:$0x1] %vm543_vm3, %v2788_v41 }
  0xff   : > { %1623 = vst.msk [vmem:[#allocation2 + $0x31] sm:$0xff] %vm541_vm2, %v1558_v34  ;;  %v3391_v59 = vpop.permute.xlu0 %1466  ;;  %v3397_v0 = vpop.f32.mrf.mxu2  ;;  %v985_v34 = vadd.f32 %v3290_v9, %v3322_v24 }
 0x100   : > { %v1173_v63 = vmul.f32 %v3299_v15, %v1107_v56  ;;  %557 = vst.msk [vmem:[#allocation2 + $0x3f0] sm:$0xff] %vm541_vm2, %v2788_v41 }
 0x101   : > { %558 = vst.msk [vmem:[#allocation2 + $0x3f8] sm:$0x1] %vm543_vm3, %v2788_v41 }
 0x102   : > { %v1239_v8 = vadd.f32 %v3309_v19, %v1173_v63  ;;  %1490 = vrot.lane.b32.xlu2 %v694_v50, %s2787_s26  ;;  %578 = vst.msk [vmem:[#allocation2 + $0x130] sm:$0x1] %vm543_vm3, %v2788_v41 }
 0x103   : > { %v924_v10 = vpop.f32.mrf.mxu0  ;;  %1394 = vrot.lane.b32.xlu1 %v3275_v3, %s2787_s26  ;;  %579 = vst.msk [vmem:[#allocation2 + $0x140] sm:$0x1] %vm543_vm3, %v2788_v41 }
 0x104   : > { %v1303_v25 = vmax.f32 %v1239_v8, 0.0  ;;  %v925_v13 = vadd.f32 %v3290_v9, %v924_v10  ;;  %580 = vst.msk [vmem:[#allocation2 + $0x150] sm:$0x1] %vm543_vm3, %v2788_v41 }
 0x105   : > { %1426 = vrot.lane.b32.xlu0 %v3168_v38, %s2787_s26  ;;  %v3408_v23 = vpop.permute.xlu1 %1468  ;;  %v1056_v28 = vpop.f32.mrf.mxu3  ;;  %581 = vst.msk [vmem:[#allocation2 + $0x160] sm:$0x1] %vm543_vm3, %v2788_v41 }
 0x106   : > { %v1559_v14 = vsel %vm698_vm1, %v1303_v25, %v1371_v46  ;;  %v1108_v16 = vmax.f32 %v925_v13, 0.0  ;;  %v1057_v3 = vadd.f32 %v3290_v9, %v1056_v28  ;;  %v3418_v31 = vpop.permute.xlu2 %1378  ;;  %583 = vst.msk [vmem:[#allocation2 + $0x180] sm:$0x1] %vm543_vm3, %v2788_v41 }
 0x107   : > { %1624 = vst.msk [vmem:[#allocation2 + $0x41] sm:$0xff] %vm541_vm2, %v1559_v14  ;;  %v3411_v26 = vpop.permute.xlu0 %1436  ;;  %v3415_v4 = vpop.f32.mrf.mxu2 }
 0x108   : > { %v1174_v30 = vmul.f32 %v3299_v15, %v1108_v16  ;;  %v1152_v1 = vmax.f32 %v1057_v3, 0.0  ;;  %v1128_v16 = vmax.f32 %v985_v34, 0.0  ;;  %584 = vst.msk [vmem:[#allocation2 + $0x190] sm:$0x1] %vm543_vm3, %v2788_v41 }
 0x109   : > { %585 = vst.msk [vmem:[#allocation2 + $0x1a0] sm:$0x1] %vm543_vm3, %v2788_v41 }
 0x10a   : > { %v1240_v38 = vadd.f32 %v3309_v19, %v1174_v30  ;;  %v1218_v29 = vmul.f32 %v3299_v15, %v1152_v1  ;;  %587 = vst.msk [vmem:[#allocation2 + $0x1c0] sm:$0x1] %vm543_vm3, %v2788_v41 }
 0x10b   : > { %v927_v32 = vpop.f32.mrf.mxu0  ;;  %588 = vst.msk [vmem:[#allocation2 + $0x1d0] sm:$0x1] %vm543_vm3, %v2788_v41 }
 0x10c   : > { %v1304_v35 = vmax.f32 %v1240_v38, 0.0  ;;  %v928_v39 = vadd.f32 %v3290_v9, %v927_v32  ;;  %v1284_v42 = vadd.f32 %v3309_v19, %v1218_v29  ;;  %589 = vst.msk [vmem:[#allocation2 + $0x1e0] sm:$0x1] %vm543_vm3, %v2788_v41 }
 0x10d   : > { %1458 = vrot.lane.b32.xlu0 %v3097_v18, %s2787_s26  ;;  %v3432_v44 = vpop.permute.xlu1 %1438  ;;  %v1059_v46 = vpop.f32.mrf.mxu3  ;;  %590 = vst.msk [vmem:[#allocation2 + $0x1f0] sm:$0x1] %vm543_vm3, %v2788_v41  ;;  %s2737_s26 = sshra.s32 %s2476_s20, 4  ;;  %s2738_s26 = int_to_ptr.hbm [resolvable:$true] %s2737_s26 }
 0x10e   : > { %v1560_v6 = vsel %vm698_vm1, %v1304_v35, %v3325_v27  ;;  %v1109_v43 = vmax.f32 %v928_v39, 0.0  ;;  %v1348_v49 = vmax.f32 %v1284_v42, 0.0  ;;  %v1060_v53 = vadd.f32 %v3290_v9, %v1059_v46  ;;  %v3441_v27 = vpop.permute.xlu2 %1442  ;;  %591 = vst.msk [vmem:[#allocation2 + $0x200] sm:$0x1] %vm543_vm3, %v2788_v41  ;;  %s2739_s28 = scalar_lea.hbm %s2738_s26, 128  ;;  %p2744_p2 = scmp.lt.s32.totalorder %s2738_s26, %s4598_s6 }
 0x10f   : > { %1625 = vst.msk [vmem:[#allocation2 + $0x51] sm:$0xff] %vm541_vm2, %v1560_v6  ;;  %v1375_v45 = vpop.permute.xlu0 %1374  ;;  %v3438_v50 = vpop.f32.mrf.mxu2  ;;  %v1194_v6 = vmul.f32 %v3299_v15, %v1128_v16  ;;  %p2740_p13 = scmp.ne.s32.totalorder %s2738_s26, %s2739_s28  ;;  %p2745_p3 = scmp.lt.s32.totalorder %s2743_s10, %s2739_s28 }
 0x110   : > { %v1175_v18 = vmul.f32 %v3299_v15, %v1109_v43  ;;  %v1604_v17 = vsel %vm698_vm1, %v1348_v49, %v3284_v5  ;;  %v1153_v55 = vmax.f32 %v1060_v53, 0.0  ;;  %592 = vst.msk [vmem:[#allocation2 + $0x210] sm:$0x1] %vm543_vm3, %v2788_v41 }
 0x111   : > { %1669 = vst.msk [vmem:[#allocation2 + $0x371] sm:$0xff] %vm541_vm2, %v1604_v17  ;;  %p2741_p0 = pnand %p2740_p13, %p2864_p6  ;;  %p2746_p4 = por %p2745_p3, %p2744_p2 }
 0x112   : > { %v1241_v54 = vadd.f32 %v3309_v19, %v1175_v18  ;;  %v1219_v8 = vmul.f32 %v3299_v15, %v1153_v55  ;;  %593 = vst.msk [vmem:[#allocation2 + $0x220] sm:$0x1] %vm543_vm3, %v2788_v41 }
 0x113   : > { %v930_v56 = vpop.f32.mrf.mxu0  ;;  %594 = vst.msk [vmem:[#allocation2 + $0x230] sm:$0x1] %vm543_vm3, %v2788_v41  ;;  %p2742_p1 = pneg %p2741_p0 }
 0x114   : > { %v1305_v63 = vmax.f32 %v1241_v54, 0.0  ;;  %v931_v10 = vadd.f32 %v3290_v9, %v930_v56  ;;  %v1285_v13 = vadd.f32 %v3309_v19, %v1219_v8  ;;  %v1260_v54 = vadd.f32 %v3309_v19, %v1194_v6  ;;  %614 = vst.msk [vmem:[#allocation2 + $0x370] sm:$0x1] %vm543_vm3, %v2788_v41 }
 0x115   : > { %v1377_v5 = vpop.permute.xlu1 %1376  ;;  %v1062_v24 = vpop.f32.mrf.mxu3  ;;  %615 = vst.msk [vmem:[#allocation2 + $0x380] sm:$0x1] %vm543_vm3, %v2788_v41  ;;  %p2747_p5 = pnand %p2746_p4, %p2742_p1 }
 0x116   : > { %v1561_v25 = vsel %vm698_vm1, %v1305_v63, %v1375_v45  ;;  %v1110_v14 = vmax.f32 %v931_v10, 0.0  ;;  %v1349_v30 = vmax.f32 %v1285_v13, 0.0  ;;  %v1063_v1 = vadd.f32 %v3290_v9, %v1062_v24  ;;  %v3460_v32 = vpop.permute.xlu2 %1476  ;;  %616 = vst.msk [vmem:[#allocation2 + $0x390] sm:$0x1] %vm543_vm3, %v2788_v41 }
 0x117   : > { %1626 = vst.msk [vmem:[#allocation2 + $0x61] sm:$0xff] %vm541_vm2, %v1561_v25  ;;  %v3454_v28 = vpop.permute.xlu0 %1408  ;;  %v3457_v38 = vpop.f32.mrf.mxu2  ;;  %v1324_v16 = vmax.f32 %v1260_v54, 0.0  ;;  %v988_v24 = vadd.f32 %v3290_v9, %v3346_v37 }
 0x118   : > { %v1176_v3 = vmul.f32 %v3299_v15, %v1110_v14  ;;  %v1605_v35 = vsel %vm698_vm1, %v1349_v30, %v3313_v20  ;;  %v1154_v39 = vmax.f32 %v1063_v1, 0.0  ;;  %v994_v20 = vadd.f32 %v3290_v9, %v3397_v0  ;;  %619 = vst.msk [vmem:[#allocation2 + $0x3c0] sm:$0x1] %vm543_vm3, %v2788_v41 }
 0x119   : > { %1670 = vst.msk [vmem:[#allocation2 + $0x381] sm:$0xff] %vm541_vm2, %v1605_v35 }
 0x11a   : > { %v1242_v29 = vadd.f32 %v3309_v19, %v1176_v3  ;;  %v1220_v45 = vmul.f32 %v3299_v15, %v1154_v39  ;;  %v1131_v10 = vmax.f32 %v994_v20, 0.0  ;;  %620 = vst.msk [vmem:[#allocation2 + $0x3d0] sm:$0x1] %vm543_vm3, %v2788_v41 }
 0x11b   : > { %v933_v42 = vpop.f32.mrf.mxu0  ;;  %621 = vst.msk [vmem:[#allocation2 + $0x3e0] sm:$0x1] %vm543_vm3, %v2788_v41 }
 0x11c   : > { %v1306_v43 = vmax.f32 %v1242_v29, 0.0  ;;  %v934_v46 = vadd.f32 %v3290_v9, %v933_v42  ;;  %v1286_v18 = vadd.f32 %v3309_v19, %v1220_v45  ;;  %v972_v29 = vpop.f32.mrf.mxu1  ;;  %v1045_v45 = vadd.f32 %v3290_v9, %v3317_v22  ;;  %623 = vst.msk [vmem:[#allocation2 + $0x400] sm:$0x1] %vm543_vm3, %v2788_v41 }
 0x11d   : > { %v3481_v17 = vpop.permute.xlu1 %1410  ;;  %v1065_v0 = vpop.f32.mrf.mxu3  ;;  %v973_v37 = vadd.f32 %v3290_v9, %v972_v29  ;;  %624 = vst.msk [vmem:[#allocation2 + $0x410] sm:$0x1] %vm543_vm3, %v2788_v41 }
 0x11e   : > { %v1562_v49 = vsel %vm698_vm1, %v1306_v43, %v1377_v5  ;;  %v1111_v53 = vmax.f32 %v934_v46, 0.0  ;;  %v1350_v34 = vmax.f32 %v1286_v18, 0.0  ;;  %v1066_v8 = vadd.f32 %v3290_v9, %v1065_v0  ;;  %v3495_v25 = vpop.permute.xlu2 %1446  ;;  %625 = vst.msk [vmem:[#allocation2 + $0x420] sm:$0x1] %vm543_vm3, %v2788_v41 }
 0x11f   : > { %1627 = vst.msk [vmem:[#allocation2 + $0x71] sm:$0xff] %vm541_vm2, %v1562_v49  ;;  %v3487_v55 = vpop.permute.xlu0 %1472  ;;  %v3490_v63 = vpop.f32.mrf.mxu2  ;;  %v1129_v46 = vmax.f32 %v988_v24, 0.0 }
 0x120   : > { %v1177_v56 = vmul.f32 %v3299_v15, %v1111_v53  ;;  %v1606_v13 = vsel %vm698_vm1, %v1350_v34, %v3272_v2  ;;  %v1155_v5 = vmax.f32 %v1066_v8, 0.0  ;;  %v1197_v2 = vmul.f32 %v3299_v15, %v1131_v10  ;;  %626 = vst.msk [vmem:[#allocation2 + $0x430] sm:$0x1] %vm543_vm3, %v2788_v41 }
 0x121   : > { %1671 = vst.msk [vmem:[#allocation2 + $0x391] sm:$0xff] %vm541_vm2, %v1606_v13  ;;  %v1124_v34 = vmax.f32 %v973_v37, 0.0  ;;  %v1195_v24 = vmul.f32 %v3299_v15, %v1129_v46 }
 0x122   : > { %v1243_v14 = vadd.f32 %v3309_v19, %v1177_v56  ;;  %v1221_v1 = vmul.f32 %v3299_v15, %v1155_v5  ;;  %v1263_v56 = vadd.f32 %v3309_v19, %v1197_v2  ;;  %627 = vst.msk [vmem:[#allocation2 + $0x440] sm:$0x1] %vm543_vm3, %v2788_v41 }
 0x123   : > { %v936_v30 = vpop.f32.mrf.mxu0  ;;  %v1190_v5 = vmul.f32 %v3299_v15, %v1124_v34  ;;  %628 = vst.msk [vmem:[#allocation2 + $0x450] sm:$0x1] %vm543_vm3, %v2788_v41 }
 0x124   : > { %v1307_v3 = vmax.f32 %v1243_v14, 0.0  ;;  %v937_v35 = vadd.f32 %v3290_v9, %v936_v30  ;;  %v1287_v6 = vadd.f32 %v3309_v19, %v1221_v1  ;;  %v991_v30 = vadd.f32 %v3290_v9, %v3371_v7  ;;  %629 = vst.msk [vmem:[#allocation2 + $0x460] sm:$0x1] %vm543_vm3, %v2788_v41 }
 0x125   : > { %v1413_v43 = vpop.permute.xlu1 %1412  ;;  %v1068_v18 = vpop.f32.mrf.mxu3  ;;  %v1327_v29 = vmax.f32 %v1263_v56, 0.0  ;;  %630 = vst.msk [vmem:[#allocation2 + $0x470] sm:$0x1] %vm543_vm3, %v2788_v41 }
 0x126   : > { %v1563_v39 = vsel %vm698_vm1, %v1307_v3, %v3418_v31  ;;  %v1112_v42 = vmax.f32 %v937_v35, 0.0  ;;  %v1580_v20 = vsel %vm698_vm1, %v1324_v16, %v1413_v43  ;;  %v1351_v53 = vmax.f32 %v1287_v6, 0.0  ;;  %v3525_v8 = vpop.permute.xlu2 %1384  ;;  %613 = vst.msk [vmem:[#allocation2 + $0x360] sm:$0x1] %vm543_vm3, %v2788_v41 }
 0x127   : > { %1628 = vst.msk [vmem:[#allocation2 + $0x81] sm:$0xff] %vm541_vm2, %v1563_v39  ;;  %v3518_v49 = vpop.permute.xlu0 %1474  ;;  %v1008_v54 = vpop.f32.mrf.mxu2  ;;  %v1069_v0 = vadd.f32 %v3290_v9, %v1068_v18  ;;  %v1148_v16 = vmax.f32 %v1045_v45, 0.0  ;;  %v1261_v18 = vadd.f32 %v3309_v19, %v1195_v24 }
 0x128   : > { %v1178_v31 = vmul.f32 %v3299_v15, %v1112_v42  ;;  %1645 = vst.msk [vmem:[#allocation2 + $0x1c1] sm:$0xff] %vm541_vm2, %v1580_v20  ;;  %v1009_v22 = vadd.f32 %v3290_v9, %v1008_v54  ;;  %v1607_v10 = vsel %vm698_vm1, %v1351_v53, %v3391_v59  ;;  %v1256_v59 = vadd.f32 %v3309_v19, %v1190_v5  ;;  %v975_v42 = vpop.f32.mrf.mxu1 }
 0x129   : > { %v1156_v14 = vmax.f32 %v1069_v0, 0.0  ;;  %1672 = vst.msk [vmem:[#allocation2 + $0x3a1] sm:$0xff] %vm541_vm2, %v1607_v10  ;;  %v976_v46 = vadd.f32 %v3290_v9, %v975_v42  ;;  %v1214_v20 = vmul.f32 %v3299_v15, %v1148_v16  ;;  %v1130_v53 = vmax.f32 %v991_v30, 0.0 }
 0x12a   : > { %v1244_v13 = vadd.f32 %v3309_v19, %v1178_v31  ;;  %v1136_v3 = vmax.f32 %v1009_v22, 0.0  ;;  %v1320_v7 = vmax.f32 %v1256_v59, 0.0  ;;  %622 = vst.msk [vmem:[#allocation2 + $0x3f0] sm:$0x1] %vm543_vm3, %v2788_v41 }
 0x12b   : > { %v939_v1 = vpop.f32.mrf.mxu0  ;;  %v1222_v35 = vmul.f32 %v3299_v15, %v1156_v14  ;;  %v1125_v30 = vmax.f32 %v976_v46, 0.0  ;;  %v1196_v59 = vmul.f32 %v3299_v15, %v1130_v53  ;;  %v3570_v53 = vadd.f32 %v3309_v19, %v1214_v20 }
 0x12c   : > { %v940_v2 = vadd.f32 %v3290_v9, %v939_v1  ;;  %v1308_v39 = vmax.f32 %v1244_v13, 0.0  ;;  %v1202_v6 = vmul.f32 %v3299_v15, %v1136_v3  ;;  %v1576_v24 = vsel %vm698_vm1, %v1320_v7, %v3388_v57 }
 0x12d   : > { %v1288_v43 = vadd.f32 %v3309_v19, %v1222_v35  ;;  %v3540_v45 = vpop.permute.xlu1 %1444  ;;  %v1071_v0 = vpop.f32.mrf.mxu3  ;;  %1641 = vst.msk [vmem:[#allocation2 + $0x171] sm:$0xff] %vm541_vm2, %v1576_v24  ;;  %v1191_v42 = vmul.f32 %v3299_v15, %v1125_v30 }
 0x12e   : > { %v1113_v37 = vmax.f32 %v940_v2, 0.0  ;;  %v1268_v31 = vadd.f32 %v3309_v19, %v1202_v6  ;;  %v1072_v13 = vadd.f32 %v3290_v9, %v1071_v0  ;;  %v1419_v16 = vpop.permute.xlu2 %1418 }
 0x12f   : > { %v1381_v54 = vpop.permute.xlu0 %1380  ;;  %v1352_v34 = vmax.f32 %v1288_v43, 0.0  ;;  %v1011_v10 = vpop.f32.mrf.mxu2  ;;  %v1583_v2 = vsel %vm698_vm1, %v1327_v29, %v1419_v16  ;;  %v1325_v43 = vmax.f32 %v1261_v18, 0.0 }
 0x130   : > { %v1179_v56 = vmul.f32 %v3299_v15, %v1113_v37  ;;  %v1564_v22 = vsel %vm698_vm1, %v1308_v39, %v1381_v54  ;;  %v1332_v14 = vmax.f32 %v1268_v31, 0.0  ;;  %v1012_v5 = vadd.f32 %v3290_v9, %v1011_v10  ;;  %1648 = vst.msk [vmem:[#allocation2 + $0x1f1] sm:$0xff] %vm541_vm2, %v1583_v2  ;;  %v978_v46 = vpop.f32.mrf.mxu1 }
 0x131   : > { %1629 = vst.msk [vmem:[#allocation2 + $0xa1] sm:$0xff] %vm541_vm2, %v1564_v22  ;;  %v1608_v3 = vsel %vm698_vm1, %v1352_v34, %v3408_v23  ;;  %v1157_v35 = vmax.f32 %v1072_v13, 0.0  ;;  %v979_v0 = vadd.f32 %v3290_v9, %v978_v46  ;;  %v1262_v34 = vadd.f32 %v3309_v19, %v1196_v59 }
 0x132   : > { %v1245_v1 = vadd.f32 %v3309_v19, %v1179_v56  ;;  %v1588_v39 = vsel %vm698_vm1, %v1332_v14, %v3262_v61  ;;  %1673 = vst.msk [vmem:[#allocation2 + $0x3b1] sm:$0xff] %vm541_vm2, %v1608_v3  ;;  %v1137_v6 = vmax.f32 %v1012_v5, 0.0  ;;  %v1257_v61 = vadd.f32 %v3309_v19, %v1191_v42 }
 0x133   : > { %v942_v57 = vpop.f32.mrf.mxu0  ;;  %1653 = vst.msk [vmem:[#allocation2 + $0x251] sm:$0xff] %vm541_vm2, %v1588_v39  ;;  %v1223_v23 = vmul.f32 %v3299_v15, %v1157_v35  ;;  %v1126_v59 = vmax.f32 %v979_v0, 0.0  ;;  %v1326_v42 = vmax.f32 %v1262_v34, 0.0 }
 0x134   : > { %v943_v29 = vadd.f32 %v3290_v9, %v942_v57  ;;  %v1309_v37 = vmax.f32 %v1245_v1, 0.0  ;;  %v1203_v7 = vmul.f32 %v3299_v15, %v1137_v6  ;;  %v1321_v14 = vmax.f32 %v1257_v61, 0.0 }
 0x135   : > { %v1289_v31 = vadd.f32 %v3309_v19, %v1223_v23  ;;  %v1383_v54 = vpop.permute.xlu1 %1382  ;;  %v1074_v13 = vpop.f32.mrf.mxu3  ;;  %v1003_v61 = vadd.f32 %v3290_v9, %v3457_v38 }
 0x136   : > { %v1114_v18 = vmax.f32 %v943_v29, 0.0  ;;  %v1269_v56 = vadd.f32 %v3309_v19, %v1203_v7  ;;  %v1565_v22 = vsel %vm698_vm1, %v1309_v37, %v1383_v54  ;;  %v1075_v30 = vadd.f32 %v3290_v9, %v1074_v13  ;;  %v3583_v35 = vpop.permute.xlu2 %1482 }
 0x137   : > { %v1415_v10 = vpop.permute.xlu0 %1414  ;;  %v1353_v5 = vmax.f32 %v1289_v31, 0.0  ;;  %1630 = vst.msk [vmem:[#allocation2 + $0xb1] sm:$0xff] %vm541_vm2, %v1565_v22  ;;  %v1014_v24 = vpop.f32.mrf.mxu2  ;;  %v1577_v2 = vsel %vm698_vm1, %v1321_v14, %v3349_v40  ;;  %v1192_v37 = vmul.f32 %v3299_v15, %v1126_v59  ;;  %v1344_v7 = vmax.f32 %v3570_v53, 0.0 }
 0x138   : > { %v1180_v16 = vmul.f32 %v3299_v15, %v1114_v18  ;;  %v1581_v20 = vsel %vm698_vm1, %v1325_v43, %v1415_v10  ;;  %v1333_v3 = vmax.f32 %v1269_v56, 0.0  ;;  %v1015_v1 = vadd.f32 %v3290_v9, %v1014_v24  ;;  %1642 = vst.msk [vmem:[#allocation2 + $0x181] sm:$0xff] %vm541_vm2, %v1577_v2  ;;  %v981_v31 = vpop.f32.mrf.mxu1 }
 0x139   : > { %1646 = vst.msk [vmem:[#allocation2 + $0x1d1] sm:$0xff] %vm541_vm2, %v1581_v20  ;;  %v1609_v39 = vsel %vm698_vm1, %v1353_v5, %v3374_v52  ;;  %v1158_v57 = vmax.f32 %v1075_v30, 0.0  ;;  %v982_v56 = vadd.f32 %v3290_v9, %v981_v31  ;;  %v1134_v20 = vmax.f32 %v1003_v61, 0.0 }
 0x13a   : > { %v1246_v6 = vadd.f32 %v3309_v19, %v1180_v16  ;;  %v1589_v43 = vsel %vm698_vm1, %v1333_v3, %v3315_v21  ;;  %1674 = vst.msk [vmem:[#allocation2 + $0x3c1] sm:$0xff] %vm541_vm2, %v1609_v39  ;;  %v1138_v23 = vmax.f32 %v1015_v1, 0.0  ;;  %v1258_v21 = vadd.f32 %v3309_v19, %v1192_v37 }
 0x13b   : > { %v945_v29 = vpop.f32.mrf.mxu0  ;;  %1654 = vst.msk [vmem:[#allocation2 + $0x261] sm:$0xff] %vm541_vm2, %v1589_v43  ;;  %v1224_v52 = vmul.f32 %v3299_v15, %v1158_v57  ;;  %v1127_v16 = vmax.f32 %v982_v56, 0.0  ;;  %v997_v57 = vadd.f32 %v3290_v9, %v3415_v4 }
 0x13c   : > { %v1310_v40 = vmax.f32 %v1246_v6, 0.0  ;;  %v1204_v46 = vmul.f32 %v3299_v15, %v1138_v23  ;;  %v946_v0 = vadd.f32 %v3290_v9, %v945_v29  ;;  %v1322_v13 = vmax.f32 %v1258_v21, 0.0 }
 0x13d   : > { %v1290_v54 = vadd.f32 %v3309_v19, %v1224_v52  ;;  %v1417_v34 = vpop.permute.xlu1 %1416  ;;  %v1077_v10 = vpop.f32.mrf.mxu3  ;;  %v1132_v61 = vmax.f32 %v997_v57, 0.0 }
 0x13e   : > { %v1566_v18 = vsel %vm698_vm1, %v1310_v40, %v3525_v8  ;;  %v1270_v53 = vadd.f32 %v3309_v19, %v1204_v46  ;;  %v1582_v38 = vsel %vm698_vm1, %v1326_v42, %v1417_v34  ;;  %v1078_v5 = vadd.f32 %v3290_v9, %v1077_v10  ;;  %v1453_v3 = vpop.permute.xlu2 %1452 }
 0x13f   : > { %1631 = vst.msk [vmem:[#allocation2 + $0xc1] sm:$0xff] %vm541_vm2, %v1566_v18  ;;  %v3610_v22 = vpop.permute.xlu0 %1478  ;;  %v1354_v14 = vmax.f32 %v1290_v54, 0.0  ;;  %v1017_v8 = vpop.f32.mrf.mxu2  ;;  %v1578_v1 = vsel %vm698_vm1, %v1322_v13, %v3454_v28  ;;  %v1115_v59 = vmax.f32 %v946_v0, 0.0  ;;  %v1600_v6 = vsel %vm698_vm1, %v1344_v7, %v1453_v3 }
 0x140   : > { %1647 = vst.msk [vmem:[#allocation2 + $0x1e1] sm:$0xff] %vm541_vm2, %v1582_v38  ;;  %v1334_v24 = vmax.f32 %v1270_v53, 0.0  ;;  %v1018_v30 = vadd.f32 %v3290_v9, %v1017_v8  ;;  %v1159_v39 = vmax.f32 %v1078_v5, 0.0  ;;  %v1193_v28 = vmul.f32 %v3299_v15, %v1127_v16 }
 0x141   : > { %v1610_v2 = vsel %vm698_vm1, %v1354_v14, %v3487_v55  ;;  %1643 = vst.msk [vmem:[#allocation2 + $0x191] sm:$0xff] %vm541_vm2, %v1578_v1  ;;  %v1181_v40 = vmul.f32 %v3299_v15, %v1115_v59 }
 0x142   : > { %v1590_v42 = vsel %vm698_vm1, %v1334_v24, %v3338_v33  ;;  %1675 = vst.msk [vmem:[#allocation2 + $0x3d1] sm:$0xff] %vm541_vm2, %v1610_v2  ;;  %v1139_v43 = vmax.f32 %v1018_v30, 0.0  ;;  %v1225_v55 = vmul.f32 %v3299_v15, %v1159_v39  ;;  %v1259_v4 = vadd.f32 %v3309_v19, %v1193_v28 }
 0x143   : > { %v948_v23 = vpop.f32.mrf.mxu0  ;;  %1655 = vst.msk [vmem:[#allocation2 + $0x271] sm:$0xff] %vm541_vm2, %v1590_v42  ;;  %v1200_v33 = vmul.f32 %v3299_v15, %v1134_v20  ;;  %v1247_v8 = vadd.f32 %v3309_v19, %v1181_v40  ;;  %v1198_v20 = vmul.f32 %v3299_v15, %v1132_v61  ;;  %v1000_v24 = vadd.f32 %v3290_v9, %v3438_v50  ;;  %v1690_v42 = vld [vmem:[#allocation2 + $0x3a0] sm:$0xff] }
 0x144   : > { %v1205_v29 = vmul.f32 %v3299_v15, %v1139_v43  ;;  %v949_v37 = vadd.f32 %v3290_v9, %v948_v23  ;;  %1665 = vst.msk [vmem:[#allocation2 + $0x321] sm:$0xff] %vm541_vm2, %v1600_v6  ;;  %v1291_v52 = vadd.f32 %v3309_v19, %v1225_v55  ;;  %v1323_v18 = vmax.f32 %v1259_v4, 0.0 }
 0x145   : > { %v3636_v7 = vpop.permute.xlu1 %1480  ;;  %v1080_v31 = vpop.f32.mrf.mxu3  ;;  %v1266_v14 = vadd.f32 %v3309_v19, %v1200_v33  ;;  %v1311_v39 = vmax.f32 %v1247_v8, 0.0  ;;  %v3675_v43 = vadd.f32 %v3309_v19, %v1198_v20  ;;  %v1133_v23 = vmax.f32 %v1000_v24, 0.0  ;;  %v3713_v20 = vld [vmem:[%s4594_s2 + $0x2] ss:$0 sm:$0xff] }
 0x146   : > { %v1271_v46 = vadd.f32 %v3309_v19, %v1205_v29  ;;  %v1355_v54 = vmax.f32 %v1291_v52, 0.0  ;;  %v1081_v34 = vadd.f32 %v3290_v9, %v1080_v31  ;;  %v1116_v53 = vmax.f32 %v949_v37, 0.0  ;;  %v3645_v10 = vpop.permute.xlu2 %1390  ;;  %v3681_v37 = vld [vmem:[%s4594_s2] ss:$0 sm:$0xff] }
 0x147   : > { %v3639_v21 = vpop.permute.xlu0 %1448  ;;  %v1020_v0 = vpop.f32.mrf.mxu2  ;;  %v1579_v13 = vsel %vm698_vm1, %v1323_v18, %v3481_v17  ;;  %v1330_v50 = vmax.f32 %v1266_v14, 0.0  ;;  %v1775_v14 = vld [vmem:[#allocation2 + $0x3a1] sm:$0xff]  ;;  %v1048_v24 = vadd.f32 %v3290_v9, %v3341_v36 }
 0x148   : > { %v1335_v56 = vmax.f32 %v1271_v46, 0.0  ;;  %v1021_v38 = vadd.f32 %v3290_v9, %v1020_v0  ;;  %v1611_v5 = vsel %vm698_vm1, %v1355_v54, %v3518_v49  ;;  %v1160_v16 = vmax.f32 %v1081_v34, 0.0  ;;  %1644 = vst.msk [vmem:[#allocation2 + $0x1a1] sm:$0xff] %vm541_vm2, %v1579_v13  ;;  %v3701_v13 = vld [vmem:[%s4594_s2 + $0x1] ss:$0 sm:$0xff] }
 0x149   : > { %1676 = vst.msk [vmem:[#allocation2 + $0x3e1] sm:$0xff] %vm541_vm2, %v1611_v5  ;;  %v1182_v2 = vmul.f32 %v3299_v15, %v1116_v53  ;;  %v1708_v0 = vmul.f32 %v3681_v37, %v1690_v42  ;;  %v1793_v36 = vmul.f32 %v3713_v20, %v1775_v14 }
 0x14a   : > { %v1591_v17 = vsel %vm698_vm1, %v1335_v56, %v3293_v11  ;;  %v1140_v30 = vmax.f32 %v1021_v38, 0.0  ;;  %v1226_v1 = vmul.f32 %v3299_v15, %v1160_v16 }
 0x14b   : > { %v951_v3 = vpop.f32.mrf.mxu0  ;;  %1656 = vst.msk [vmem:[#allocation2 + $0x281] sm:$0xff] %vm541_vm2, %v1591_v17  ;;  %v1248_v46 = vadd.f32 %v3309_v19, %v1182_v2 }
 0x14c   : > { %v952_v49 = vadd.f32 %v3290_v9, %v951_v3  ;;  %v1206_v59 = vmul.f32 %v3299_v15, %v1140_v30  ;;  %v1292_v11 = vadd.f32 %v3309_v19, %v1226_v1  ;;  %v1826_v1 = vld [vmem:[#allocation2 + $0x170] sm:$0xff] }
 0x14d   : > { %v3670_v57 = vpop.permute.xlu1 %1450  ;;  %v1083_v29 = vpop.f32.mrf.mxu3  ;;  %v1312_v2 = vmax.f32 %v1248_v46, 0.0 }
 0x14e   : > { %v1117_v6 = vmax.f32 %v952_v49, 0.0  ;;  %v1272_v28 = vadd.f32 %v3309_v19, %v1206_v59  ;;  %v1356_v4 = vmax.f32 %v1292_v11, 0.0  ;;  %v1084_v61 = vadd.f32 %v3290_v9, %v1083_v29  ;;  %v1425_v54 = vpop.permute.xlu2 %1424 }
 0x14f   : > { %v1387_v55 = vpop.permute.xlu0 %1386  ;;  %v1023_v52 = vpop.f32.mrf.mxu2  ;;  %v1586_v38 = vsel %vm698_vm1, %v1330_v50, %v1425_v54  ;;  %v1199_v49 = vmul.f32 %v3299_v15, %v1133_v23  ;;  %v3731_v50 = vld [vmem:[%s4594_s2 + $0x3] ss:$0 sm:$0xff] }
 0x150   : > { %v1183_v33 = vmul.f32 %v3299_v15, %v1117_v6  ;;  %v1567_v40 = vsel %vm698_vm1, %v1311_v39, %v1387_v55  ;;  %v1336_v31 = vmax.f32 %v1272_v28, 0.0  ;;  %v1024_v18 = vadd.f32 %v3290_v9, %v1023_v52  ;;  %1651 = vst.msk [vmem:[#allocation2 + $0x221] sm:$0xff] %vm541_vm2, %v1586_v38 }
 0x151   : > { %1632 = vst.msk [vmem:[#allocation2 + $0xd1] sm:$0xff] %vm541_vm2, %v1567_v40  ;;  %v1612_v34 = vsel %vm698_vm1, %v1356_v4, %v3460_v32  ;;  %v1161_v53 = vmax.f32 %v1084_v61, 0.0  ;;  %v1328_v39 = vmax.f32 %v3675_v43, 0.0  ;;  %v1844_v43 = vmul.f32 %v3731_v50, %v1826_v1 }
 0x152   : > { %v1249_v56 = vadd.f32 %v3309_v19, %v1183_v33  ;;  %v1592_v8 = vsel %vm698_vm1, %v1336_v31, %v3411_v26  ;;  %1677 = vst.msk [vmem:[#allocation2 + $0x401] sm:$0xff] %vm541_vm2, %v1612_v34  ;;  %v1141_v32 = vmax.f32 %v1024_v18, 0.0  ;;  %v1725_v16 = vld [vmem:[#allocation2 + $0x281] sm:$0xff]  ;;  %v1876_v33 = vld [vmem:[#allocation2 + $0x51] sm:$0xff]  ;;  %v1149_v40 = vmax.f32 %v1048_v24, 0.0 }
 0x153   : > { %v3708_v5 = vpop.f32.mrf.mxu0  ;;  %1657 = vst.msk [vmem:[#allocation2 + $0x291] sm:$0xff] %vm541_vm2, %v1592_v8  ;;  %v1227_v30 = vmul.f32 %v3299_v15, %v1161_v53  ;;  %v2174_v26 = vld [vmem:[%s4596_s4] sm:$0xf]  ;;  %v1743_v3 = vmul.f32 %v3701_v13, %v1725_v16  ;;  %v3749_v31 = vld [vmem:[%s4594_s2 + $0x4] ss:$0 sm:$0xff]  ;;  %v1926_v18 = vld [vmem:[#allocation2 + $0x171] sm:$0xff]  ;;  %v1265_v54 = vadd.f32 %v3309_v19, %v1199_v49 }
 0x154   : > { %v1313_v17 = vmax.f32 %v1249_v56, 0.0  ;;  %v1207_v59 = vmul.f32 %v3299_v15, %v1141_v32  ;;  %2619 = vmatpush.msk.msrb.mxu1 %vm891_vm0, %v2174_v26  ;;  %v3757_v53 = vld [vmem:[%s4594_s2 + $0x5] ss:$0 sm:$0xff]  ;;  %v1894_v8 = vmul.f32 %v3749_v31, %v1876_v33 }
 0x155   : > { %v1293_v11 = vadd.f32 %v3309_v19, %v1227_v30  ;;  %v1389_v42 = vpop.permute.xlu1 %1388  ;;  %v1759_v23 = vadd.f32 %v1743_v3, %v1708_v0  ;;  %v1086_v4 = vpop.f32.mrf.mxu3  ;;  %v1215_v30 = vmul.f32 %v3299_v15, %v1149_v40  ;;  %v3776_v3 = vld [vmem:[#allocation2 + $0x3b0] sm:$0xff]  ;;  %v3811_v40 = vld [vmem:[%s4595_s3] ss:$0 sm:$0xff] }
 0x156   : > { %v1569_v6 = vsel %vm698_vm1, %v1313_v17, %v3645_v10  ;;  %v1273_v28 = vadd.f32 %v3309_v19, %v1207_v59  ;;  %v1568_v55 = vsel %vm698_vm1, %v1312_v2, %v1389_v42  ;;  %v1087_v46 = vadd.f32 %v3290_v9, %v1086_v4  ;;  %v3784_v59 = vld [vmem:[%s4594_s2 + $0x7] ss:$0 sm:$0xff] }
 0x157   : > { %1634 = vst.msk [vmem:[#allocation2 + $0xf1] sm:$0xff] %vm541_vm2, %v1569_v6  ;;  %v1421_v29 = vpop.permute.xlu0 %1420  ;;  %v1357_v52 = vmax.f32 %v1293_v11, 0.0  ;;  %v1026_v61 = vpop.f32.mrf.mxu2  ;;  %v1809_v56 = vadd.f32 %v1793_v36, %v1759_v23  ;;  %v1944_v17 = vmul.f32 %v3757_v53, %v1926_v18  ;;  %v1281_v4 = vadd.f32 %v3309_v19, %v1215_v30 }
 0x158   : > { %1633 = vst.msk [vmem:[#allocation2 + $0xe1] sm:$0xff] %vm541_vm2, %v1568_v55  ;;  %v1584_v10 = vsel %vm698_vm1, %v1328_v39, %v1421_v29  ;;  %v1337_v0 = vmax.f32 %v1273_v28, 0.0  ;;  %v1027_v34 = vadd.f32 %v3290_v9, %v1026_v61  ;;  %v1162_v14 = vmax.f32 %v1087_v46, 0.0  ;;  %v3802_v29 = vld [vmem:[%s4594_s2 + $0x8] ss:$0 sm:$0xff] }
 0x159   : > { %1649 = vst.msk [vmem:[#allocation2 + $0x201] sm:$0xff] %vm541_vm2, %v1584_v10  ;;  %v1613_v38 = vsel %vm698_vm1, %v1357_v52, %v3610_v22  ;;  %v1860_v24 = vadd.f32 %v1844_v43, %v1809_v56  ;;  %v3771_v22 = vld [vmem:[%s4594_s2 + $0x6] ss:$0 sm:$0xff]  ;;  %v3814_v10 = vld [vmem:[#allocation2 + $0x3b1] sm:$0xff] }
 0x15a   : > { %v1593_v32 = vsel %vm698_vm1, %v1337_v0, %v3432_v44  ;;  %1678 = vst.msk [vmem:[#allocation2 + $0x411] sm:$0xff] %vm541_vm2, %v1613_v38  ;;  %v1142_v9 = vmax.f32 %v1027_v34, 0.0  ;;  %v1228_v26 = vmul.f32 %v3299_v15, %v1162_v14  ;;  %v1329_v44 = vmax.f32 %v1265_v54, 0.0  ;;  %v3789_v11 = vld [vmem:[#allocation2 + $0x291] sm:$0xff] }
 0x15b   : > { %v957_v16 = vpop.f32.mrf.mxu0  ;;  %1658 = vst.msk [vmem:[#allocation2 + $0x2a1] sm:$0xff] %vm541_vm2, %v1593_v32  ;;  %v1910_v49 = vadd.f32 %v1894_v8, %v1860_v24  ;;  %v1995_v2 = vmul.f32 %v3771_v22, %v3776_v3  ;;  %v2046_v55 = vmul.f32 %v3784_v59, %v3789_v11  ;;  %v1051_v54 = vadd.f32 %v3811_v40, %v3366_v48 }
 0x15c   : > { %v1208_v1 = vmul.f32 %v3299_v15, %v1142_v9  ;;  %v1294_v36 = vadd.f32 %v3309_v19, %v1228_v26  ;;  %v1054_v0 = vadd.f32 %v3811_v40, %v3393_v12  ;;  %v1006_v38 = vadd.f32 %v3811_v40, %v3490_v63  ;;  %v3838_v12 = vld [vmem:[%s4595_s3 + $0x1] ss:$0 sm:$0xff] }
 0x15d   : > { %v1423_v39 = vpop.permute.xlu1 %1422  ;;  %v1089_v23 = vpop.f32.mrf.mxu3  ;;  %v1960_v28 = vadd.f32 %v1944_v17, %v1910_v49  ;;  %v1345_v63 = vmax.f32 %v1281_v4, 0.0  ;;  %v1150_v30 = vmax.f32 %v1051_v54, 0.0  ;;  %v958_v26 = vadd.f32 %v3811_v40, %v957_v16 }
 0x15e   : > { %v1274_v15 = vadd.f32 %v3309_v19, %v1208_v1  ;;  %v1585_v6 = vsel %vm698_vm1, %v1329_v44, %v1423_v39  ;;  %v1358_v43 = vmax.f32 %v1294_v36, 0.0  ;;  %v1090_v52 = vadd.f32 %v3811_v40, %v1089_v23  ;;  %v3853_v44 = vld [vmem:[%s4595_s3 + $0x2] ss:$0 sm:$0xff] }
 0x15f   : > { %v3795_v42 = vpop.permute.xlu0 %1484  ;;  %1650 = vst.msk [vmem:[#allocation2 + $0x211] sm:$0xff] %vm541_vm2, %v1585_v6  ;;  %v1029_v33 = vpop.f32.mrf.mxu2  ;;  %v2011_v18 = vadd.f32 %v1995_v2, %v1960_v28  ;;  %v2096_v19 = vmul.f32 %v3802_v29, %v3814_v10  ;;  %v1151_v2 = vmax.f32 %v1054_v0, 0.0  ;;  %v1216_v0 = vmul.f32 %v3838_v12, %v1150_v30 }
 0x160   : > { %v1338_v61 = vmax.f32 %v1274_v15, 0.0  ;;  %v1030_v46 = vadd.f32 %v3811_v40, %v1029_v33  ;;  %v1614_v34 = vsel %vm698_vm1, %v1358_v43, %v3636_v7  ;;  %v1163_v56 = vmax.f32 %v1090_v52, 0.0 }
 0x161   : > { %1679 = vst.msk [vmem:[#allocation2 + $0x421] sm:$0xff] %vm541_vm2, %v1614_v34  ;;  %v2062_v32 = vadd.f32 %v2046_v55, %v2011_v18 }
 0x162   : > { %v1594_v14 = vsel %vm698_vm1, %v1338_v61, %v3399_v60  ;;  %v1143_v8 = vmax.f32 %v1030_v46, 0.0  ;;  %v1229_v7 = vmul.f32 %v3838_v12, %v1163_v56  ;;  %v955_v60 = vadd.f32 %v3811_v40, %v3708_v5 }
 0x163   : > { %v960_v48 = vpop.f32.mrf.mxu0  ;;  %1659 = vst.msk [vmem:[#allocation2 + $0x2b1] sm:$0xff] %vm541_vm2, %v1594_v14  ;;  %v3845_v17 = vadd.f32 %v2096_v19, %v2062_v32  ;;  %v1135_v5 = vmax.f32 %v1006_v38, 0.0  ;;  %v1119_v46 = vmax.f32 %v958_v26, 0.0  ;;  %v1217_v38 = vmul.f32 %v3838_v12, %v1151_v2 }
 0x164   : > { %v961_v9 = vadd.f32 %v3811_v40, %v960_v48  ;;  %v1209_v24 = vmul.f32 %v3838_v12, %v1143_v8  ;;  %v1295_v1 = vadd.f32 %v3853_v44, %v1229_v7  ;;  %v1118_v33 = vmax.f32 %v955_v60, 0.0 }
 0x165   : > { %4602 = vst [vmem:[#allocation7_spill] sm:$0xff] %v3845_v17  ;;  %v1092_v15 = vpop.f32.mrf.mxu3  ;;  %v2162_v6 = vmax.f32 %v3845_v17, 0.0  ;;  %v3859_v16 = vpop.permute.xlu1 %1486  ;;  %v1201_v14 = vmul.f32 %v3838_v12, %v1135_v5  ;;  %v3888_v26 = vadd.f32 %v3853_v44, %v1217_v38  ;;  %v1979_v17 = vld [vmem:[#allocation2 + $0x3d0] sm:$0xff] }
 0x166   : > { %v1120_v49 = vmax.f32 %v961_v9, 0.0  ;;  %v1275_v36 = vadd.f32 %v3853_v44, %v1209_v24  ;;  %v1359_v23 = vmax.f32 %v1295_v1, 0.0  ;;  %v1093_v43 = vadd.f32 %v3811_v40, %v1092_v15 }
 0x167   : > { %v1455_v39 = vpop.permute.xlu0 %1454  ;;  %v1032_v4 = vpop.f32.mrf.mxu2  ;;  %2385 = vrot.lane.b32.xlu2 %v2162_v6, %s2789_s11  ;;  %v1184_v48 = vmul.f32 %v3838_v12, %v1118_v33  ;;  %v1185_v9 = vmul.f32 %v3838_v12, %v1119_v46  ;;  %v1282_v24 = vadd.f32 %v3853_v44, %v1216_v0  ;;  %v3891_v1 = vadd.f32 %v3853_v44, %v1201_v14 }
 0x168   : > { %v1186_v28 = vmul.f32 %v3838_v12, %v1120_v49  ;;  %v1601_v55 = vsel %vm698_vm1, %v1345_v63, %v1455_v39  ;;  %v1339_v52 = vmax.f32 %v1275_v36, 0.0  ;;  %v1033_v61 = vadd.f32 %v3811_v40, %v1032_v4  ;;  %v1872_v36 = vld [vmem:[#allocation2 + $0x11] sm:$0xff] }
 0x169   : > { %1666 = vst.msk [vmem:[#allocation2 + $0x331] sm:$0xff] %vm541_vm2, %v1601_v55  ;;  %v1615_v18 = vsel %vm698_vm1, %v1359_v23, %v3583_v35  ;;  %v1164_v54 = vmax.f32 %v1093_v43, 0.0  ;;  %v3895_v39 = vadd.f32 %v3853_v44, %v1185_v9  ;;  %v1874_v55 = vld [vmem:[#allocation2 + $0x31] sm:$0xff]  ;;  %v1346_v4 = vmax.f32 %v1282_v24, 0.0  ;;  %v1927_v24 = vld [vmem:[#allocation2 + $0x181] sm:$0xff] }
 0x16a   : > { %v1252_v19 = vadd.f32 %v3853_v44, %v1186_v28  ;;  %v1595_v34 = vsel %vm698_vm1, %v1339_v52, %v3441_v27  ;;  %1680 = vst.msk [vmem:[#allocation2 + $0x431] sm:$0xff] %vm541_vm2, %v1615_v18  ;;  %v1144_v56 = vmax.f32 %v1033_v61, 0.0  ;;  %v1873_v28 = vld [vmem:[#allocation2 + $0x21] sm:$0xff]  ;;  %v1347_v52 = vmax.f32 %v3888_v26, 0.0 }
 0x16b   : > { %1660 = vst.msk [vmem:[#allocation2 + $0x2c1] sm:$0xff] %vm541_vm2, %v1595_v34  ;;  %v1230_v35 = vmul.f32 %v3838_v12, %v1164_v54  ;;  %v963_v7 = vpop.f32.mrf.mxu0  ;;  %v1331_v61 = vmax.f32 %v3891_v1, 0.0  ;;  %v1877_v18 = vld [vmem:[#allocation2 + $0x61] sm:$0xff]  ;;  %v1878_v34 = vld [vmem:[#allocation2 + $0x71] sm:$0xff]  ;;  %v3915_v38 = vmul.f32 %v3749_v31, %v1874_v55  ;;  %v1315_v14 = vmax.f32 %v3895_v39, 0.0 }
 0x16c   : > { %v1316_v8 = vmax.f32 %v1252_v19, 0.0  ;;  %v1210_v32 = vmul.f32 %v3838_v12, %v1144_v56  ;;  %v964_v60 = vadd.f32 %v3811_v40, %v963_v7  ;;  %v3908_v19 = vmul.f32 %v3749_v31, %v1872_v36  ;;  %v2079_v55 = vld [vmem:[#allocation2 + $0x3c1] sm:$0xff] }
 0x16d   : > { %v1296_v63 = vadd.f32 %v3853_v44, %v1230_v35  ;;  %v1457_v23 = vpop.permute.xlu1 %1456  ;;  %v3912_v56 = vmul.f32 %v3749_v31, %v1873_v28  ;;  %4604 = vst [vmem:[#allocation9_spill] sm:$0xff] %v3915_v38  ;;  %v1709_v35 = vmul.f32 %v3681_v37, %v3776_v3  ;;  %v3928_v3 = vmul.f32 %v3749_v31, %v1878_v34 }
 0x16e   : > { %v1572_v27 = vsel %vm698_vm1, %v1316_v8, %v3264_v62  ;;  %v1276_v30 = vadd.f32 %v3853_v44, %v1210_v32  ;;  %v1121_v2 = vmax.f32 %v964_v60, 0.0  ;;  %v1250_v62 = vadd.f32 %v3853_v44, %v1184_v48  ;;  %4603 = vst [vmem:[#allocation8_spill] sm:$0xff] %v3908_v19  ;;  %v1827_v32 = vld [vmem:[#allocation2 + $0x180] sm:$0xff] }
 0x16f   : > { %1637 = vst.msk [vmem:[#allocation2 + $0x131] sm:$0xff] %vm541_vm2, %v1572_v27  ;;  %v1360_v49 = vmax.f32 %v1296_v63, 0.0  ;;  %v1393_v33 = vpop.permute.xlu0 %1392  ;;  %v1035_v46 = vpop.f32.mrf.mxu2  ;;  %v1744_v48 = vmul.f32 %v3701_v13, %v3789_v11  ;;  %v1794_v63 = vmul.f32 %v3713_v20, %v3814_v10  ;;  %v1895_v60 = vmul.f32 %v3749_v31, %v1877_v18  ;;  %v2029_v10 = vld [vmem:[#allocation2 + $0x2a1] sm:$0xff] }
 0x170   : > { %v1340_v5 = vmax.f32 %v1276_v30, 0.0  ;;  %v1187_v6 = vmul.f32 %v3838_v12, %v1121_v2  ;;  %v1314_v54 = vmax.f32 %v1250_v62, 0.0  ;;  %v1036_v0 = vadd.f32 %v3811_v40, %v1035_v46  ;;  %v1879_v30 = vld [vmem:[#allocation2 + $0x81] sm:$0xff] }
 0x171   : > { %v1616_v15 = vsel %vm698_vm1, %v1360_v49, %v3795_v42  ;;  %v1760_v2 = vadd.f32 %v1744_v48, %v1709_v35  ;;  %v1845_v62 = vmul.f32 %v3731_v50, %v1827_v32  ;;  %v3931_v11 = vsel %vm698_vm1, %v1346_v4, %v1457_v23  ;;  %v1980_v19 = vld [vmem:[#allocation2 + $0x3e0] sm:$0xff] }
 0x172   : > { %v1596_v43 = vsel %vm698_vm1, %v1340_v5, %v3540_v45  ;;  %1681 = vst.msk [vmem:[#allocation2 + $0x441] sm:$0xff] %vm541_vm2, %v1616_v15  ;;  %v1253_v42 = vadd.f32 %v3853_v44, %v1187_v6  ;;  %v1095_v45 = vpop.f32.mrf.mxu3  ;;  %v1145_v27 = vmax.f32 %v1036_v0, 0.0  ;;  %v3934_v5 = vsel %vm698_vm1, %v1314_v54, %v1393_v33 }
 0x173   : > { %1661 = vst.msk [vmem:[#allocation2 + $0x2e1] sm:$0xff] %vm541_vm2, %v1596_v43  ;;  %v1096_v8 = vadd.f32 %v3811_v40, %v1095_v45  ;;  %v966_v7 = vpop.f32.mrf.mxu0  ;;  %v1810_v6 = vadd.f32 %v1794_v63, %v1760_v2  ;;  %v1945_v28 = vmul.f32 %v3757_v53, %v1927_v24  ;;  %v3949_v33 = vmul.f32 %v3784_v59, %v2029_v10 }
 0x174   : > { %v1317_v9 = vmax.f32 %v1253_v42, 0.0  ;;  %v1211_v36 = vmul.f32 %v3838_v12, %v1145_v27  ;;  %v967_v39 = vadd.f32 %v3811_v40, %v966_v7  ;;  %v3941_v42 = vmul.f32 %v3749_v31, %v1879_v30  ;;  %v1928_v27 = vld [vmem:[#allocation2 + $0x191] sm:$0xff]  ;;  %1667 = vst.msk [vmem:[#allocation2 + $0x341] sm:$0xff] %vm541_vm2, %v3931_v11  ;;  %v2025_v11 = vld [vmem:[#allocation2 + $0x261] sm:$0xff] }
 0x175   : > { %v1165_v49 = vmax.f32 %v1096_v8, 0.0  ;;  %v1395_v43 = vpop.permute.xlu1 %1394  ;;  %v1861_v0 = vadd.f32 %v1845_v62, %v1810_v6  ;;  %v3955_v45 = vmul.f32 %v3802_v29, %v2079_v55  ;;  %v1828_v8 = vld [vmem:[#allocation2 + $0x190] sm:$0xff]  ;;  %v3988_v6 = vmul.f32 %v3757_v53, %v1928_v27  ;;  %1635 = vst.msk [vmem:[#allocation2 + $0x101] sm:$0xff] %vm541_vm2, %v3934_v5 }
 0x176   : > { %v3945_v23 = vsel %vm698_vm1, %v1317_v9, %v3218_v51  ;;  %v1277_v4 = vadd.f32 %v3853_v44, %v1211_v36  ;;  %v1122_v46 = vmax.f32 %v967_v39, 0.0  ;;  %v3958_v51 = vmul.f32 %v3701_v13, %v2029_v10  ;;  %v2030_v10 = vld [vmem:[#allocation2 + $0x2b1] sm:$0xff] }
 0x177   : > { %v1231_v15 = vmul.f32 %v3838_v12, %v1165_v49  ;;  %v1427_v18 = vpop.permute.xlu0 %1426  ;;  %v1038_v34 = vpop.f32.mrf.mxu2  ;;  %v3964_v48 = vsel %vm698_vm1, %v1315_v14, %v1395_v43  ;;  %v3968_v9 = vmul.f32 %v3713_v20, %v2079_v55  ;;  %v1911_v30 = vadd.f32 %v1895_v60, %v1861_v0  ;;  %v2080_v43 = vld [vmem:[#allocation2 + $0x3d1] sm:$0xff]  ;;  %v2031_v0 = vld [vmem:[#allocation2 + $0x2c1] sm:$0xff]  ;;  %1638 = vst.msk [vmem:[#allocation2 + $0x141] sm:$0xff] %vm541_vm2, %v3945_v23 }
 0x178   : > { %v1188_v35 = vmul.f32 %v3838_v12, %v1122_v46  ;;  %v1039_v32 = vadd.f32 %v3811_v40, %v1038_v34  ;;  %v1341_v63 = vmax.f32 %v1277_v4, 0.0  ;;  %v3977_v36 = vmul.f32 %v3731_v50, %v1828_v8  ;;  %v1829_v4 = vld [vmem:[#allocation2 + $0x1a0] sm:$0xff]  ;;  %v1973_v23 = vld [vmem:[#allocation2 + $0x370] sm:$0xff]  ;;  %1636 = vst.msk [vmem:[#allocation2 + $0x111] sm:$0xff] %vm541_vm2, %v3964_v48 }
 0x179   : > { %v1297_v54 = vadd.f32 %v3853_v44, %v1231_v15  ;;  %v3985_v60 = vsel %vm698_vm1, %v1331_v61, %v1427_v18  ;;  %v3991_v55 = vmul.f32 %v3784_v59, %v2030_v10  ;;  %v3997_v1 = vmul.f32 %v3802_v29, %v2080_v43  ;;  %v1929_v18 = vld [vmem:[#allocation2 + $0x1a1] sm:$0xff] }
 0x17a   : > { %v1098_v7 = vpop.f32.mrf.mxu3  ;;  %v1254_v14 = vadd.f32 %v3853_v44, %v1188_v35  ;;  %v1146_v62 = vmax.f32 %v1039_v32, 0.0  ;;  %v4003_v34 = vsel %vm698_vm1, %v1341_v63, %v3495_v25  ;;  %v1961_v35 = vadd.f32 %v1945_v28, %v1911_v30  ;;  %v1729_v63 = vld [vmem:[#allocation2 + $0x2d1] sm:$0xff]  ;;  %1652 = vst.msk [vmem:[#allocation2 + $0x231] sm:$0xff] %vm541_vm2, %v3985_v60 }
 0x17b   : > { %v1361_v24 = vmax.f32 %v1297_v54, 0.0  ;;  %v1099_v49 = vadd.f32 %v3811_v40, %v1098_v7  ;;  %v969_v2 = vpop.f32.mrf.mxu0  ;;  %v2081_v7 = vld [vmem:[#allocation2 + $0x3e1] sm:$0xff]  ;;  %v1796_v25 = vmul.f32 %v3713_v20, %v2080_v43  ;;  %v4024_v30 = vmul.f32 %v3757_v53, %v1929_v18  ;;  %1662 = vst.msk [vmem:[#allocation2 + $0x2f1] sm:$0xff] %vm541_vm2, %v4003_v34 }
 0x17c   : > { %v970_v39 = vadd.f32 %v3811_v40, %v969_v2  ;;  %v1318_v46 = vmax.f32 %v1254_v14, 0.0  ;;  %v1212_v54 = vmul.f32 %v3838_v12, %v1146_v62  ;;  %v1746_v14 = vmul.f32 %v3701_v13, %v2030_v10  ;;  %v1779_v62 = vld [vmem:[#allocation2 + $0x3f1] sm:$0xff]  ;;  %v1830_v10 = vld [vmem:[#allocation2 + $0x1c0] sm:$0xff] }
 0x17d   : > { %v1166_v15 = vmax.f32 %v1099_v49, 0.0  ;;  %v4007_v8 = vsel %vm698_vm1, %v1361_v24, %v3859_v16  ;;  %v1847_v24 = vmul.f32 %v3731_v50, %v1829_v4 }
 0x17e   : > { %v1123_v61 = vmax.f32 %v970_v39, 0.0  ;;  %v1278_v27 = vadd.f32 %v3853_v44, %v1212_v54  ;;  %v4020_v16 = vsel %vm698_vm1, %v1318_v46, %v3247_v58  ;;  %v4027_v39 = vmul.f32 %v3784_v59, %v2031_v0  ;;  %v1978_v54 = vld [vmem:[#allocation2 + $0x3c0] sm:$0xff]  ;;  %1682 = vst.msk [vmem:[#allocation2 + $0x451] sm:$0xff] %vm541_vm2, %v4007_v8 }
 0x17f   : > { %v1232_v32 = vmul.f32 %v3838_v12, %v1166_v15  ;;  %v1459_v2 = vpop.permute.xlu0 %1458  ;;  %v1041_v28 = vpop.f32.mrf.mxu2  ;;  %v4035_v46 = vmul.f32 %v3802_v29, %v2081_v7  ;;  %v4046_v0 = vmul.f32 %v3701_v13, %v1729_v63  ;;  %v1880_v7 = vld [vmem:[#allocation2 + $0xa1] sm:$0xff]  ;;  %v1710_v26 = vmul.f32 %v3681_v37, %v1978_v54  ;;  %1639 = vst.msk [vmem:[#allocation2 + $0x151] sm:$0xff] %vm541_vm2, %v4020_v16 }
 0x180   : > { %v1189_v49 = vmul.f32 %v3838_v12, %v1123_v61  ;;  %v1042_v58 = vadd.f32 %v3811_v40, %v1041_v28  ;;  %v4042_v61 = vsel %vm698_vm1, %v1347_v52, %v1459_v2  ;;  %v1342_v28 = vmax.f32 %v1278_v27, 0.0 }
 0x181   : > { %v1298_v15 = vadd.f32 %v3853_v44, %v1232_v32  ;;  %4605 = vst [vmem:[#allocation10_spill] sm:$0xff] %v4046_v0  ;;  %v4049_v32 = vmul.f32 %v3713_v20, %v1779_v62  ;;  %v4056_v52 = vmul.f32 %v3731_v50, %v1830_v10  ;;  %v1711_v62 = vmul.f32 %v3681_v37, %v1979_v17 }
 0x182   : > { %v1255_v43 = vadd.f32 %v3853_v44, %v1189_v49  ;;  %v1101_v4 = vpop.f32.mrf.mxu3  ;;  %v1996_v49 = vmul.f32 %v3771_v22, %v1978_v54  ;;  %v1147_v63 = vmax.f32 %v1042_v58, 0.0  ;;  %v1761_v54 = vadd.f32 %v3958_v51, %v1710_v26  ;;  %v1489_v58 = vpop.permute.xlu2 %1488  ;;  %1668 = vst.msk [vmem:[#allocation2 + $0x351] sm:$0xff] %vm541_vm2, %v4042_v61 }
 0x183   : > { %v1102_v18 = vadd.f32 %v3811_v40, %v1101_v4  ;;  %4606 = vst [vmem:[#allocation11_spill] sm:$0xff] %v4049_v32  ;;  %v1930_v40 = vld [vmem:[#allocation2 + $0x1c1] sm:$0xff]  ;;  %v1362_v27 = vmax.f32 %v1298_v15, 0.0  ;;  %v4065_v10 = vmul.f32 %v3749_v31, %v1880_v7  ;;  %v1762_v32 = vadd.f32 %v1746_v14, %v1711_v62 }
 0x184   : > { %4607 = vst [vmem:[#allocation12_spill] sm:$0xff] %v4056_v52  ;;  %v1319_v2 = vmax.f32 %v1255_v43, 0.0  ;;  %v2012_v38 = vadd.f32 %v1996_v49, %v1961_v35  ;;  %v1213_v52 = vmul.f32 %v3838_v12, %v1147_v63  ;;  %v4070_v0 = vmul.f32 %v3757_v53, %v1930_v40  ;;  %v1981_v7 = vld [vmem:[#allocation2 + $0x400] sm:$0xff]  ;;  %v1881_v63 = vld [vmem:[#allocation2 + $0xb1] sm:$0xff] }
 0x185   : > { %v1167_v4 = vmax.f32 %v1102_v18, 0.0  ;;  %v4075_v35 = vsel %vm698_vm1, %v1342_v28, %v3639_v21  ;;  %v1811_v51 = vadd.f32 %v3968_v9, %v1761_v54  ;;  %v1997_v15 = vmul.f32 %v3771_v22, %v1979_v17  ;;  %v2032_v49 = vld [vmem:[#allocation2 + $0x2e1] sm:$0xff] }
 0x186   : > { %v2063_v18 = vadd.f32 %v3949_v33, %v2012_v38  ;;  %v4081_v14 = vsel %vm698_vm1, %v1319_v2, %v3364_v47  ;;  %v1812_v26 = vadd.f32 %v1796_v25, %v1762_v32  ;;  %v1998_v40 = vmul.f32 %v3771_v22, %v1980_v19  ;;  %v2082_v38 = vld [vmem:[#allocation2 + $0x401] sm:$0xff]  ;;  %v1831_v33 = vld [vmem:[#allocation2 + $0x1d0] sm:$0xff]  ;;  %1663 = vst.msk [vmem:[#allocation2 + $0x301] sm:$0xff] %vm541_vm2, %v4075_v35 }
 0x187   : > { %v1233_v43 = vmul.f32 %v3838_v12, %v1167_v4  ;;  %v1279_v12 = vadd.f32 %v3853_v44, %v1213_v52  ;;  %v1862_v9 = vadd.f32 %v3977_v36, %v1811_v51  ;;  %v4091_v28 = vsel %vm698_vm1, %v1362_v27, %v1489_v58  ;;  %v1931_v47 = vld [vmem:[#allocation2 + $0x1d1] sm:$0xff]  ;;  %v1721_v52 = vld [vmem:[#allocation2 + $0x241] sm:$0xff]  ;;  %1640 = vst.msk [vmem:[#allocation2 + $0x161] sm:$0xff] %vm541_vm2, %v4081_v14 }
 0x188   : > { %v4086_v21 = vadd.f32 %v3955_v45, %v2063_v18  ;;  %v1863_v32 = vadd.f32 %v1847_v24, %v1812_v26  ;;  %v4096_v19 = vmul.f32 %v3771_v22, %v1981_v7  ;;  %v4099_v45 = vmul.f32 %v3784_v59, %v2032_v49  ;;  %v1771_v36 = vld [vmem:[#allocation2 + $0x361] sm:$0xff]  ;;  %v1822_v4 = vld [vmem:[#allocation2 + $0x130] sm:$0xff]  ;;  %v4608_v35 = vld [vmem:[#allocation10_spill] sm:$0xff]  ;;  %1683 = vst.msk [vmem:[#allocation2 + $0x461] sm:$0xff] %vm541_vm2, %v4091_v28 }
 0x189   : > { %v1299_v17 = vadd.f32 %v3853_v44, %v1233_v43  ;;  %v1343_v25 = vmax.f32 %v1279_v12, 0.0  ;;  %v1912_v2 = vadd.f32 %v3928_v3, %v1862_v9  ;;  %v4104_v62 = vmul.f32 %v3802_v29, %v2082_v38  ;;  %v1922_v27 = vld [vmem:[#allocation2 + $0x131] sm:$0xff] }
 0x18a   : > { %v2163_v44 = vmax.f32 %v4086_v21, 0.0  ;;  %v4107_v24 = vmul.f32 %v3731_v50, %v1831_v33  ;;  %v1913_v54 = vadd.f32 %v3941_v42, %v1863_v32  ;;  %v4111_v43 = vmul.f32 %v3701_v13, %v1721_v52  ;;  %v2024_v58 = vld [vmem:[#allocation2 + $0x251] sm:$0xff]  ;;  %v4609_v61 = vld [vmem:[#allocation11_spill] sm:$0xff] }
 0x18b   : > { %v2074_v18 = vld [vmem:[#allocation2 + $0x371] sm:$0xff]  ;;  %v4114_v51 = vmul.f32 %v3749_v31, %v1881_v63  ;;  %v4117_v3 = vmul.f32 %v3757_v53, %v1931_v47  ;;  %v1962_v12 = vadd.f32 %v3988_v6, %v1912_v2  ;;  %v4125_v42 = vsel %vm698_vm1, %v1343_v25, %v3670_v57  ;;  %v1491_v25 = vpop.permute.xlu2 %1490  ;;  %v4610_v28 = vld [vmem:[#allocation12_spill] sm:$0xff] }
 0x18c   : > { %2387 = vrot.lane.b32.xlu0 %v2163_v44, %s2789_s11  ;;  %v1363_v26 = vmax.f32 %v1299_v17, 0.0  ;;  %v4128_v33 = vmul.f32 %v3713_v20, %v1771_v36  ;;  %v1963_v9 = vadd.f32 %v4024_v30, %v1913_v54  ;;  %v4134_v63 = vmul.f32 %v3731_v50, %v1822_v4  ;;  %v1823_v4 = vld [vmem:[#allocation2 + $0x140] sm:$0xff]  ;;  %1664 = vst.msk [vmem:[#allocation2 + $0x311] sm:$0xff] %vm541_vm2, %v4125_v42 }
 0x18d   : > { %v4137_v47 = vmul.f32 %v3757_v53, %v1922_v27  ;;  %v1705_v6 = vmul.f32 %v3681_v37, %v1973_v23  ;;  %v2013_v57 = vadd.f32 %v1997_v15, %v1962_v12  ;;  %v4143_v17 = vmul.f32 %v3771_v22, %v1973_v23  ;;  %v1974_v27 = vld [vmem:[#allocation2 + $0x380] sm:$0xff] }
 0x18e   : > { %v1740_v41 = vmul.f32 %v3701_v13, %v2024_v58  ;;  %v1790_v30 = vmul.f32 %v3713_v20, %v2074_v18  ;;  %v2014_v32 = vadd.f32 %v1998_v40, %v1963_v9  ;;  %v4150_v52 = vmul.f32 %v3784_v59, %v2024_v58  ;;  %v2075_v23 = vld [vmem:[#allocation2 + $0x381] sm:$0xff] }
 0x18f   : > { %v4153_v36 = vmul.f32 %v3802_v29, %v2074_v18  ;;  %v1713_v15 = vmul.f32 %v3681_v37, %v1981_v7  ;;  %v2064_v44 = vadd.f32 %v3991_v55, %v2013_v57  ;;  %v1748_v5 = vmul.f32 %v3701_v13, %v2032_v49  ;;  %v1923_v18 = vld [vmem:[#allocation2 + $0x141] sm:$0xff] }
 0x190   : > { %v1756_v2 = vadd.f32 %v1740_v41, %v1705_v6  ;;  %v1798_v40 = vmul.f32 %v3713_v20, %v2082_v38  ;;  %v2065_v54 = vadd.f32 %v4027_v39, %v2014_v32  ;;  %v1619_v7 = vsel %vm698_vm1, %v1363_v26, %v1491_v25  ;;  %v1686_v39 = vld [vmem:[#allocation2 + $0x360] sm:$0xff]  ;;  %v1694_v6 = vld [vmem:[#allocation2 + $0x3f0] sm:$0xff] }
 0x191   : > { %v1841_v58 = vmul.f32 %v3731_v50, %v1823_v4  ;;  %v1992_v34 = vmul.f32 %v3771_v22, %v1974_v27  ;;  %v4170_v55 = vadd.f32 %v3997_v1, %v2064_v44  ;;  %v2043_v38 = vmul.f32 %v3784_v59, %v2025_v11  ;;  %v1982_v44 = vld [vmem:[#allocation2 + $0x410] sm:$0xff]  ;;  %1684 = vst.msk [vmem:[#allocation2 + $0x471] sm:$0xff] %vm541_vm2, %v1619_v7 }
 0x192   : > { %v1806_v49 = vadd.f32 %v1790_v30, %v1756_v2  ;;  %v1764_v12 = vadd.f32 %v1748_v5, %v1713_v15  ;;  %v4176_v8 = vadd.f32 %v4035_v46, %v2065_v54  ;;  %v1706_v26 = vmul.f32 %v3681_v37, %v1974_v27  ;;  %v2033_v5 = vld [vmem:[#allocation2 + $0x2f1] sm:$0xff] }
 0x193   : > { %v1741_v9 = vmul.f32 %v3701_v13, %v2025_v11  ;;  %v1791_v16 = vmul.f32 %v3713_v20, %v2075_v23  ;;  %v2164_v1 = vmax.f32 %v4170_v55, 0.0  ;;  %v1704_v57 = vmul.f32 %v3681_v37, %v1686_v39  ;;  %v1832_v39 = vld [vmem:[#allocation2 + $0x1e0] sm:$0xff]  ;;  %v1975_v7 = vld [vmem:[#allocation2 + $0x390] sm:$0xff] }
 0x194   : > { %v1857_v25 = vadd.f32 %v1841_v58, %v1806_v49  ;;  %v1814_v48 = vadd.f32 %v1798_v40, %v1764_v12  ;;  %v2165_v46 = vmax.f32 %v4176_v8, 0.0  ;;  %v1712_v41 = vmul.f32 %v3681_v37, %v1694_v6  ;;  %v1824_v58 = vld [vmem:[#allocation2 + $0x150] sm:$0xff] }
 0x195   : > { %v1941_v30 = vmul.f32 %v3757_v53, %v1923_v18  ;;  %v1757_v32 = vadd.f32 %v1741_v9, %v1706_v26  ;;  %2389 = vrot.lane.b32.xlu1 %v2164_v1, %s2789_s11  ;;  %v1755_v60 = vadd.f32 %v4111_v43, %v1704_v57  ;;  %v2093_v4 = vmul.f32 %v3802_v29, %v2075_v23  ;;  %v2083_v43 = vld [vmem:[#allocation2 + $0x411] sm:$0xff] }
 0x196   : > { %v1907_v11 = vadd.f32 %v3912_v56, %v1857_v25  ;;  %v1865_v15 = vadd.f32 %v4107_v24, %v1814_v48  ;;  %2391 = vrot.lane.b32.xlu2 %v2165_v46, %s2789_s11  ;;  %v1763_v2 = vadd.f32 %v4608_v35, %v1712_v41  ;;  %v2000_v27 = vmul.f32 %v3771_v22, %v1982_v44  ;;  %v1924_v25 = vld [vmem:[#allocation2 + $0x151] sm:$0xff] }
 0x197   : > { %v1805_v56 = vadd.f32 %v4128_v33, %v1755_v60  ;;  %v1807_v40 = vadd.f32 %v1791_v16, %v1757_v32  ;;  %v2051_v23 = vmul.f32 %v3784_v59, %v2033_v5  ;;  %v1714_v49 = vmul.f32 %v3681_v37, %v1982_v44  ;;  %v4611_v37 = vld [vmem:[#allocation8_spill] sm:$0xff]  ;;  %v2026_v46 = vld [vmem:[#allocation2 + $0x271] sm:$0xff] }
 0x198   : > { %v1957_v14 = vadd.f32 %v1941_v30, %v1907_v11  ;;  %v1915_v24 = vadd.f32 %v4114_v51, %v1865_v15  ;;  %v1813_v54 = vadd.f32 %v4609_v61, %v1763_v2  ;;  %v1749_v18 = vmul.f32 %v3701_v13, %v2033_v5  ;;  %v1932_v32 = vld [vmem:[#allocation2 + $0x1e1] sm:$0xff]  ;;  %v4612_v44 = vld [vmem:[#allocation9_spill] sm:$0xff] }
 0x199   : > { %v1856_v42 = vadd.f32 %v4134_v63, %v1805_v56  ;;  %v1842_v12 = vmul.f32 %v3731_v50, %v1824_v58  ;;  %v2101_v9 = vmul.f32 %v3802_v29, %v2083_v43  ;;  %v1799_v1 = vmul.f32 %v3713_v20, %v2083_v43  ;;  %v4237_v58 = vld [vmem:[%s4595_s3 + $0x3] ss:$0 sm:$0xff] }
 0x19a   : > { %v2008_v33 = vadd.f32 %v1992_v34, %v1957_v14  ;;  %v1965_v51 = vadd.f32 %v4117_v3, %v1915_v24  ;;  %v1864_v26 = vadd.f32 %v4610_v28, %v1813_v54  ;;  %v1765_v16 = vadd.f32 %v1749_v18, %v1714_v49  ;;  %v1882_v34 = vld [vmem:[#allocation2 + $0xc1] sm:$0xff] }
 0x19b   : > { %v1906_v6 = vadd.f32 %v4611_v37, %v1856_v42  ;;  %v1858_v63 = vadd.f32 %v1842_v12, %v1807_v40  ;;  %v1993_v48 = vmul.f32 %v3771_v22, %v1975_v7  ;;  %v1850_v30 = vmul.f32 %v3731_v50, %v1832_v39  ;;  %v2034_v54 = vld [vmem:[#allocation2 + $0x301] sm:$0xff] }
 0x19c   : > { %v2059_v13 = vadd.f32 %v2043_v38, %v2008_v33  ;;  %v2016_v57 = vadd.f32 %v2000_v27, %v1965_v51  ;;  %v1914_v3 = vadd.f32 %v4065_v10, %v1864_v26  ;;  %v1815_v41 = vadd.f32 %v1799_v1, %v1765_v16  ;;  %v2076_v27 = vld [vmem:[#allocation2 + $0x391] sm:$0xff]  ;;  %v1825_v12 = vld [vmem:[#allocation2 + $0x160] sm:$0xff] }
 0x19d   : > { %v1956_v60 = vadd.f32 %v4137_v47, %v1906_v6  ;;  %v1908_v38 = vadd.f32 %v4612_v44, %v1858_v63  ;;  %v1942_v2 = vmul.f32 %v3757_v53, %v1924_v25  ;;  %v1900_v10 = vmul.f32 %v3749_v31, %v1882_v34  ;;  %v1983_v47 = vld [vmem:[#allocation2 + $0x420] sm:$0xff] }
 0x19e   : > { %v2109_v11 = vadd.f32 %v2093_v4, %v2059_v13  ;;  %v2067_v15 = vadd.f32 %v2051_v23, %v2016_v57  ;;  %v1964_v35 = vadd.f32 %v4070_v0, %v1914_v3  ;;  %v1866_v5 = vadd.f32 %v1850_v30, %v1815_v41  ;;  %v2084_v26 = vld [vmem:[#allocation2 + $0x421] sm:$0xff] }
 0x19f   : > { %v2007_v56 = vadd.f32 %v4143_v17, %v1956_v60  ;;  %v2044_v24 = vmul.f32 %v3784_v59, %v2026_v46  ;;  %v1950_v43 = vmul.f32 %v3757_v53, %v1932_v32  ;;  %v1958_v40 = vadd.f32 %v1942_v2, %v1908_v38 }
 0x1a0   : > { %v2159_v14 = vmax.f32 %v2109_v11, 0.0  ;;  %v2015_v4 = vadd.f32 %v4096_v19, %v1964_v35  ;;  %v1916_v61 = vadd.f32 %v1900_v10, %v1866_v5  ;;  %v2001_v0 = vmul.f32 %v3771_v22, %v1983_v47  ;;  %v4288_v35 = vld [vmem:[%s4594_s2 + $0x2] ss:$0 sm:$0xff] }
 0x1a1   : > { %v2058_v23 = vadd.f32 %v4150_v52, %v2007_v56  ;;  %v4240_v17 = vadd.f32 %v2101_v9, %v2067_v15  ;;  %v2094_v49 = vmul.f32 %v3802_v29, %v2076_v27  ;;  %v2052_v19 = vmul.f32 %v3784_v59, %v2034_v54  ;;  %v4248_v52 = vld [vmem:[%s4594_s2] ss:$0 sm:$0xff]  ;;  %v4295_v5 = vld [vmem:[#allocation2 + $0x441] sm:$0xff] }
 0x1a2   : > { %2379 = vrot.lane.b32.xlu2 %v2159_v14, %s2789_s11  ;;  %v2066_v18 = vadd.f32 %v4099_v45, %v2015_v4  ;;  %v2009_v42 = vadd.f32 %v1993_v48, %v1958_v40  ;;  %v1966_v33 = vadd.f32 %v1950_v43, %v1916_v61  ;;  %v1707_v51 = vmul.f32 %v4248_v52, %v1975_v7  ;;  %v4258_v45 = vld [vmem:[%s4594_s2 + $0x1] ss:$0 sm:$0xff] }
 0x1a3   : > { %v2108_v39 = vadd.f32 %v4153_v36, %v2058_v23  ;;  %v4253_v28 = vadd.f32 %v4237_v58, %v2109_v11  ;;  %v1742_v9 = vmul.f32 %v4258_v45, %v2026_v46  ;;  %v1792_v16 = vmul.f32 %v3713_v20, %v2076_v27  ;;  %v1875_v7 = vld [vmem:[#allocation2 + $0x41] sm:$0xff]  ;;  %v1833_v11 = vld [vmem:[#allocation2 + $0x1f0] sm:$0xff] }
 0x1a4   : > { %v4263_v1 = vadd.f32 %v4104_v62, %v2066_v18  ;;  %v2060_v37 = vadd.f32 %v2044_v24, %v2009_v42  ;;  %v2017_v6 = vadd.f32 %v2001_v0, %v1966_v33  ;;  %v2102_v36 = vmul.f32 %v3802_v29, %v2084_v26  ;;  %v1925_v46 = vld [vmem:[#allocation2 + $0x161] sm:$0xff]  ;;  %v1986_v18 = vld [vmem:[#allocation2 + $0x450] sm:$0xff] }
 0x1a5   : > { %v2158_v13 = vmax.f32 %v2108_v39, 0.0  ;;  %v2126_v57 = vadd.f32 %v4237_v58, %v2108_v39  ;;  %v1758_v63 = vadd.f32 %v1742_v9, %v1707_v51  ;;  %v1843_v25 = vmul.f32 %v3731_v50, %v1825_v12  ;;  %v4293_v27 = vld [vmem:[#allocation2 + $0x321] sm:$0xff]  ;;  %v2037_v42 = vld [vmem:[#allocation2 + $0x331] sm:$0xff] }
 0x1a6   : > { %v2166_v34 = vmax.f32 %v4263_v1, 0.0  ;;  %v4269_v3 = vadd.f32 %v2094_v49, %v2060_v37  ;;  %v2068_v48 = vadd.f32 %v2052_v19, %v2017_v6  ;;  %v1715_v41 = vmul.f32 %v4248_v52, %v1983_v47  ;;  %v2714_v14 = vld [vmem:[#allocation2 + $0x3a0] sm:$0xff]  ;;  %v1883_v47 = vld [vmem:[#allocation2 + $0xd1] sm:$0xff] }
 0x1a7   : > { %2377 = vrot.lane.b32.xlu1 %v2158_v13, %s2789_s11  ;;  %v2142_v20 = vmax.f32 %v2126_v57, 0.0  ;;  %v1808_v62 = vadd.f32 %v1792_v16, %v1758_v63  ;;  %v2167_v30 = vmax.f32 %v4240_v17, 0.0  ;;  %v1893_v50 = vmul.f32 %v3749_v31, %v1875_v7  ;;  %v4291_v31 = vld [vmem:[#allocation2 + $0x440] sm:$0xff]  ;;  %v1933_v49 = vld [vmem:[#allocation2 + $0x1f1] sm:$0xff] }
 0x1a8   : > { %2393 = vrot.lane.b32.xlu0 %v2166_v34, %s2789_s11  ;;  %v4275_v32 = vadd.f32 %v2102_v36, %v2068_v48  ;;  %v1750_v60 = vmul.f32 %v4258_v45, %v2034_v54  ;;  %v2143_v15 = vmax.f32 %v4253_v28, 0.0  ;;  %v4283_v44 = vadd.f32 %v4237_v58, %v4269_v3  ;;  %v2715_v61 = vld [vmem:[#allocation2 + $0x281] sm:$0xff]  ;;  %v1984_v9 = vld [vmem:[#allocation2 + $0x430] sm:$0xff] }
 0x1a9   : > { %2620 = vmatmul.msk.f32.vlgmr.msrb.gmra.mxu1 %vm698_vm1, %v2142_v20  ;;  %v1859_v38 = vadd.f32 %v1843_v25, %v1808_v62  ;;  %v1800_v2 = vmul.f32 %v4288_v35, %v2084_v26  ;;  %v1943_v56 = vmul.f32 %v3757_v53, %v1925_v46  ;;  %v1994_v24 = vmul.f32 %v2714_v14, %v3771_v22  ;;  %v4305_v54 = vld [vmem:[%s4594_s2 + $0x3] ss:$0 sm:$0xff]  ;;  %v4320_v28 = vld [vmem:[%s4594_s2 + $0x4] ss:$0 sm:$0xff]  ;;  %v1835_v16 = vld [vmem:[#allocation2 + $0x210] sm:$0xff] }
 0x1aa   : > { %v2168_v10 = vmax.f32 %v4275_v32, 0.0  ;;  %v1766_v43 = vadd.f32 %v1750_v60, %v1715_v41  ;;  %v2160_v4 = vmax.f32 %v4269_v3, 0.0  ;;  %v2045_v0 = vmul.f32 %v2715_v61, %v3784_v59  ;;  %v2717_v12 = vld [vmem:[#allocation2 + $0x3a1] sm:$0xff]  ;;  %v2087_v37 = vld [vmem:[#allocation2 + $0x451] sm:$0xff] }
 0x1ab   : > { %v1909_v40 = vadd.f32 %v1893_v50, %v1859_v38  ;;  %v1851_v23 = vmul.f32 %v4305_v54, %v1833_v11  ;;  %v1717_v22 = vmul.f32 %v4248_v52, %v4291_v31  ;;  %v1752_v19 = vmul.f32 %v4258_v45, %v4293_v27  ;;  %v4326_v36 = vld [vmem:[%s4594_s2 + $0x5] ss:$0 sm:$0xff]  ;;  %v2035_v63 = vld [vmem:[#allocation2 + $0x311] sm:$0xff]  ;;  %v4339_v3 = vld [vmem:[%s4594_s2 + $0x7] ss:$0 sm:$0xff] }
 0x1ac   : > { %2397 = vrot.lane.b32.xlu2 %v2168_v10, %s2789_s11  ;;  %v1816_v53 = vadd.f32 %v1800_v2, %v1766_v43  ;;  %v1802_v59 = vmul.f32 %v4288_v35, %v4295_v5  ;;  %v2144_v33 = vmax.f32 %v4283_v44, 0.0  ;;  %v2095_v39 = vmul.f32 %v2717_v12, %v3802_v29  ;;  %v4332_v29 = vld [vmem:[%s4594_s2 + $0x6] ss:$0 sm:$0xff]  ;;  %v1885_v7 = vld [vmem:[#allocation2 + $0xf1] sm:$0xff]  ;;  %v4351_v10 = vld [vmem:[%s4594_s2 + $0x8] ss:$0 sm:$0xff] }
 0x1ad   : > { %v1959_v51 = vadd.f32 %v1943_v56, %v1909_v40  ;;  %v1901_v26 = vmul.f32 %v4320_v28, %v1883_v47  ;;  %v1951_v13 = vmul.f32 %v4326_v36, %v1933_v49  ;;  %v2002_v57 = vmul.f32 %v4332_v29, %v1984_v9  ;;  %v1935_v20 = vld [vmem:[#allocation2 + $0x211] sm:$0xff]  ;;  %v1836_v38 = vld [vmem:[#allocation2 + $0x220] sm:$0xff] }
 0x1ae   : > { %v1867_v6 = vadd.f32 %v1851_v23, %v1816_v53  ;;  %v1768_v25 = vadd.f32 %v1752_v19, %v1717_v22  ;;  %v2053_v48 = vmul.f32 %v4339_v3, %v2035_v63  ;;  %v1718_v62 = vmul.f32 %v4248_v52, %v1986_v18  ;;  %v2085_v50 = vld [vmem:[#allocation2 + $0x431] sm:$0xff]  ;;  %v1886_v61 = vld [vmem:[#allocation2 + $0x101] sm:$0xff] }
 0x1af   : > { %2395 = vrot.lane.b32.xlu1 %v2167_v30, %s2789_s11  ;;  %v2010_v34 = vadd.f32 %v1994_v24, %v1959_v51  ;;  %v1753_v46 = vmul.f32 %v4258_v45, %v2037_v42  ;;  %v1853_v30 = vmul.f32 %v4305_v54, %v1835_v16  ;;  %v1803_v11 = vmul.f32 %v4288_v35, %v2087_v37  ;;  %v1936_v19 = vld [vmem:[#allocation2 + $0x221] sm:$0xff] }
 0x1b0   : > { %2381 = vrot.lane.b32.xlu0 %v2160_v4, %s2789_s11  ;;  %v1917_v41 = vadd.f32 %v1901_v26, %v1867_v6  ;;  %v1818_v60 = vadd.f32 %v1802_v59, %v1768_v25  ;;  %v2103_v56 = vmul.f32 %v4351_v10, %v2085_v50  ;;  %v1903_v14 = vmul.f32 %v4320_v28, %v1885_v7  ;;  %v2038_v59 = vld [vmem:[#allocation2 + $0x341] sm:$0xff] }
 0x1b1   : > { %2621 = vmatmul.msk.f32.gmra.mxu1 %vm698_vm1, %v2143_v15  ;;  %v2061_v2 = vadd.f32 %v2045_v0, %v2010_v34  ;;  %v1769_v24 = vadd.f32 %v1753_v46, %v1718_v62  ;;  %v1953_v4 = vmul.f32 %v4326_v36, %v1935_v20  ;;  %v2004_v40 = vmul.f32 %v4332_v29, %v1986_v18  ;;  %v1884_v34 = vld [vmem:[#allocation2 + $0xe1] sm:$0xff] }
 0x1b2   : > { %v1967_v43 = vadd.f32 %v1951_v13, %v1917_v41  ;;  %v1869_v47 = vadd.f32 %v1853_v30, %v1818_v60  ;;  %v1854_v0 = vmul.f32 %v4305_v54, %v1836_v38  ;;  %v1716_v49 = vmul.f32 %v4248_v52, %v1984_v9  ;;  %v1987_v9 = vld [vmem:[#allocation2 + $0x460] sm:$0xff] }
 0x1b3   : > { %v2111_v23 = vadd.f32 %v2095_v39, %v2061_v2  ;;  %v1819_v15 = vadd.f32 %v1803_v11, %v1769_v24  ;;  %v1751_v51 = vmul.f32 %v4258_v45, %v2035_v63  ;;  %v1801_v12 = vmul.f32 %v4288_v35, %v2085_v50  ;;  %v1834_v39 = vld [vmem:[#allocation2 + $0x200] sm:$0xff] }
 0x1b4   : > { %v2018_v53 = vadd.f32 %v2002_v57, %v1967_v43  ;;  %v1919_v22 = vadd.f32 %v1903_v14, %v1869_v47  ;;  %v2055_v16 = vmul.f32 %v4339_v3, %v2037_v42  ;;  %v1904_v18 = vmul.f32 %v4320_v28, %v1886_v61  ;;  %v2088_v50 = vld [vmem:[#allocation2 + $0x461] sm:$0xff] }
 0x1b5   : > { %v2161_v26 = vmax.f32 %v2111_v23, 0.0  ;;  %v1870_v6 = vadd.f32 %v1854_v0, %v1819_v15  ;;  %v2105_v7 = vmul.f32 %v4351_v10, %v2087_v37  ;;  %v1767_v57 = vadd.f32 %v1751_v51, %v1716_v49  ;;  %v1934_v37 = vld [vmem:[#allocation2 + $0x201] sm:$0xff] }
 0x1b6   : > { %v2069_v13 = vadd.f32 %v2053_v48, %v2018_v53  ;;  %v1969_v25 = vadd.f32 %v1953_v4, %v1919_v22  ;;  %v1954_v63 = vmul.f32 %v4326_v36, %v1936_v19  ;;  %v2005_v62 = vmul.f32 %v4332_v29, %v1987_v9 }
 0x1b7   : > { %2383 = vrot.lane.b32.xlu1 %v2161_v26, %s2789_s11  ;;  %v1920_v20 = vadd.f32 %v1904_v18, %v1870_v6  ;;  %v2056_v42 = vmul.f32 %v4339_v3, %v2038_v59  ;;  %v1817_v48 = vadd.f32 %v1801_v12, %v1767_v57  ;;  %v1852_v60 = vmul.f32 %v4305_v54, %v1834_v39  ;;  %v1988_v26 = vld [vmem:[#allocation2 + $0x470] sm:$0xff] }
 0x1b8   : > { %v4368_v46 = vadd.f32 %v2103_v56, %v2069_v13  ;;  %v2020_v41 = vadd.f32 %v2004_v40, %v1969_v25  ;;  %v2129_v30 = vadd.f32 %v4237_v58, %v2111_v23  ;;  %v1902_v38 = vmul.f32 %v4320_v28, %v1884_v34  ;;  %v1837_v40 = vld [vmem:[#allocation2 + $0x230] sm:$0xff] }
 0x1b9   : > { %2622 = vmatmul.msk.f32.gmra.mxu1 %vm698_vm1, %v2144_v33  ;;  %v1970_v11 = vadd.f32 %v1954_v63, %v1920_v20  ;;  %v1719_v2 = vmul.f32 %v4248_v52, %v1987_v9  ;;  %v1868_v24 = vadd.f32 %v1852_v60, %v1817_v48  ;;  %v1754_v43 = vmul.f32 %v4258_v45, %v2038_v59  ;;  %v1887_v45 = vld [vmem:[#allocation2 + $0x111] sm:$0xff] }
 0x1ba   : > { %v2169_v56 = vmax.f32 %v4368_v46, 0.0  ;;  %v2071_v14 = vadd.f32 %v2055_v16, %v2020_v41  ;;  %v2106_v4 = vmul.f32 %v4351_v10, %v2088_v50  ;;  %v1952_v44 = vmul.f32 %v4326_v36, %v1934_v37  ;;  %v2039_v57 = vld [vmem:[#allocation2 + $0x351] sm:$0xff] }
 0x1bb   : > { %v2021_v47 = vadd.f32 %v2005_v62, %v1970_v11  ;;  %v1804_v33 = vmul.f32 %v4288_v35, %v2088_v50  ;;  %v1918_v23 = vadd.f32 %v1902_v38, %v1868_v24  ;;  %v2003_v52 = vmul.f32 %v4332_v29, %v4291_v31  ;;  %v1937_v35 = vld [vmem:[#allocation2 + $0x231] sm:$0xff] }
 0x1bc   : > { %2399 = vrot.lane.b32.xlu0 %v2169_v56, %s2789_s11  ;;  %v4383_v61 = vadd.f32 %v2105_v7, %v2071_v14  ;;  %v1770_v15 = vadd.f32 %v1754_v43, %v1719_v2  ;;  %v2145_v0 = vmax.f32 %v2129_v30, 0.0  ;;  %v1855_v59 = vmul.f32 %v4305_v54, %v1837_v40  ;;  %v2089_v34 = vld [vmem:[#allocation2 + $0x471] sm:$0xff] }
 0x1bd   : > { %v2072_v49 = vadd.f32 %v2056_v42, %v2021_v47  ;;  %v1968_v22 = vadd.f32 %v1952_v44, %v1918_v23  ;;  %v2054_v12 = vmul.f32 %v4339_v3, %v4293_v27  ;;  %v2104_v31 = vmul.f32 %v4351_v10, %v4295_v5  ;;  %v4613_v27 = vld [vmem:[#allocation7_spill] sm:$0xff] }
 0x1be   : > { %v2171_v53 = vmax.f32 %v4383_v61, 0.0  ;;  %v1820_v19 = vadd.f32 %v1804_v33, %v1770_v15  ;;  %v1905_v18 = vmul.f32 %v4320_v28, %v1887_v45  ;;  %v1955_v39 = vmul.f32 %v4326_v36, %v1937_v35  ;;  %v4439_v44 = vld [vmem:[%s4597_s5] ss:$0 sm:$0xff]  ;;  %v4445_v23 = vld [vmem:[%s4597_s5 + $0x1] ss:$0 sm:$0xff] }
 0x1bf   : > { %v2122_v51 = vadd.f32 %v2106_v4, %v2072_v49  ;;  %v2019_v16 = vadd.f32 %v2003_v52, %v1968_v22  ;;  %v2006_v7 = vmul.f32 %v4332_v29, %v1988_v26  ;;  %v2130_v9 = vadd.f32 %v4237_v58, %v4613_v27  ;;  %v4452_v15 = vld [vmem:[%s4597_s5 + $0x2] ss:$0 sm:$0xff] }
 0x1c0   : > { %2403 = vrot.lane.b32.xlu2 %v2171_v53, %s2789_s11  ;;  %v1871_v6 = vadd.f32 %v1855_v59, %v1820_v19  ;;  %v2057_v62 = vmul.f32 %v4339_v3, %v2039_v57  ;;  %v2107_v36 = vmul.f32 %v4351_v10, %v2089_v34  ;;  %v2131_v50 = vadd.f32 %v4237_v58, %v4086_v21 }
 0x1c1   : > { %2623 = vmatmul.msk.f32.gmra.mxu1 %vm698_vm1, %v2145_v0  ;;  %v2172_v54 = vmax.f32 %v2122_v51, 0.0  ;;  %v2070_v13 = vadd.f32 %v2054_v12, %v2019_v16  ;;  %v2146_v42 = vmax.f32 %v2130_v9, 0.0  ;;  %v2132_v3 = vadd.f32 %v4237_v58, %v4170_v55  ;;  %v2386_v40 = vpop.permute.xlu2 %2385 }
 0x1c2   : > { %v1921_v25 = vadd.f32 %v1905_v18, %v1871_v6  ;;  %v2147_v60 = vmax.f32 %v2131_v50, 0.0  ;;  %v2133_v37 = vadd.f32 %v4237_v58, %v4176_v8  ;;  %v2134_v21 = vadd.f32 %v4237_v58, %v4263_v1 }
 0x1c3   : > { %v2120_v5 = vadd.f32 %v2104_v31, %v2070_v13  ;;  %v2148_v10 = vmax.f32 %v2132_v3, 0.0  ;;  %v2135_v38 = vadd.f32 %v4237_v58, %v4240_v17  ;;  %v2136_v55 = vadd.f32 %v4237_v58, %v4275_v32 }
 0x1c4   : > { %2405 = vrot.lane.b32.xlu0 %v2172_v54, %s2789_s11  ;;  %v1971_v20 = vadd.f32 %v1955_v39, %v1921_v25  ;;  %v2149_v30 = vmax.f32 %v2133_v37, 0.0  ;;  %v2150_v11 = vmax.f32 %v2134_v21, 0.0  ;;  %v2137_v8 = vadd.f32 %v4237_v58, %v4368_v46 }
 0x1c5   : > { %v2170_v63 = vmax.f32 %v2120_v5, 0.0  ;;  %v2151_v2 = vmax.f32 %v2135_v38, 0.0  ;;  %v2152_v56 = vmax.f32 %v2136_v55, 0.0  ;;  %v2138_v1 = vadd.f32 %v4237_v58, %v2120_v5 }
 0x1c6   : > { %v2022_v28 = vadd.f32 %v2006_v7, %v1971_v20  ;;  %v2153_v14 = vmax.f32 %v2137_v8, 0.0  ;;  %v2139_v17 = vadd.f32 %v4237_v58, %v4383_v61  ;;  %v2140_v32 = vadd.f32 %v4237_v58, %v2122_v51 }
 0x1c7   : > { %2401 = vrot.lane.b32.xlu1 %v2170_v63, %s2789_s11  ;;  %v2154_v24 = vmax.f32 %v2138_v1, 0.0 }
 0x1c8   : > { %v2073_v41 = vadd.f32 %v2057_v62, %v2022_v28  ;;  %v2155_v43 = vmax.f32 %v2139_v17, 0.0  ;;  %v2156_v47 = vmax.f32 %v2140_v32, 0.0 }
 0x1c9   : > { %2624 = vmatmul.msk.f32.gmra.mxu1 %vm698_vm1, %v2146_v42 }
 0x1ca   : > { %v2123_v29 = vadd.f32 %v2107_v36, %v2073_v41 }
 0x1cc   : > { %v2173_v48 = vmax.f32 %v2123_v29, 0.0  ;;  %v2141_v46 = vadd.f32 %v4237_v58, %v2123_v29 }
 0x1ce   : > { %v2157_v4 = vmax.f32 %v2141_v46, 0.0 }
 0x1cf   : > { %2407 = vrot.lane.b32.xlu1 %v2173_v48, %s2789_s11 }
 0x1d1   : > { %2625 = vmatmul.msk.f32.gmra.mxu1 %vm698_vm1, %v2147_v60 }
 0x1d9   : > { %2626 = vmatmul.msk.f32.gmra.mxu1 %vm698_vm1, %v2148_v10 }
 0x1e1   : > { %2627 = vmatmul.msk.f32.gmra.mxu1 %vm698_vm1, %v2149_v30 }
 0x1e9   : > { %2628 = vmatmul.msk.f32.gmra.mxu1 %vm698_vm1, %v2150_v11 }
 0x1f0   : > { %v4457_v53 = vpop.permute.xlu2 %2391 }
 0x1f1   : > { %2629 = vmatmul.msk.f32.gmra.mxu1 %vm698_vm1, %v2151_v2 }
 0x1f9   : > { %2630 = vmatmul.msk.f32.gmra.mxu1 %vm698_vm1, %v2152_v56 }
 0x1fc   : > { %v2380_v39 = vpop.permute.xlu2 %2379 }
 0x1fe   : > { %v2388_v59 = vpop.permute.xlu0 %2387 }
 0x201   : > { %2631 = vmatmul.msk.f32.gmra.mxu1 %vm698_vm1, %v2153_v14 }
 0x207   : > { %v4447_v52 = vpop.permute.xlu1 %2389 }
 0x209   : > { %2632 = vmatmul.msk.f32.gmra.mxu1 %vm698_vm1, %v2154_v24 }
 0x211   : > { %2633 = vmatmul.msk.f32.gmra.mxu1 %vm698_vm1, %v2155_v43 }
 0x219   : > { %2634 = vmatmul.msk.f32.gmra.mxu1 %vm698_vm1, %v2156_v47  ;;  %v2378_v35 = vpop.permute.xlu1 %2377 }
 0x21a   : > { %v2394_v54 = vpop.permute.xlu0 %2393 }
 0x221   : > { %2635 = vmatmul.msk.f32.gmra.mxu1 %vm698_vm1, %v2157_v4  ;;  %v2396_v5 = vpop.permute.xlu1 %2395 }
 0x222   : > { %v2382_v20 = vpop.permute.xlu0 %2381 }
 0x226   : > { %v2245_v33 = vpop.f32.mrf.mxu1 }
 0x227   : > { %v2246_v61 = vadd.f32 %v4439_v44, %v2245_v33 }
 0x229   : > { %v2293_v58 = vmax.f32 %v2246_v61, 0.0  ;;  %v2384_v50 = vpop.permute.xlu1 %2383 }
 0x22b   : > { %v2311_v0 = vmul.f32 %v4445_v23, %v2293_v58 }
 0x22d   : > { %v2329_v49 = vadd.f32 %v4452_v15, %v2311_v0 }
 0x22e   : > { %v2248_v45 = vpop.f32.mrf.mxu1 }
 0x22f   : > { %v2345_v22 = vmax.f32 %v2329_v49, 0.0  ;;  %v2249_v19 = vadd.f32 %v4439_v44, %v2248_v45 }
 0x231   : > { %v2426_v51 = vsel %vm2425_vm4, %v2345_v22, %v2378_v35  ;;  %v2294_v12 = vmax.f32 %v2249_v19, 0.0 }
 0x232   : > { %2443 = vst.msk [vmem:[%s4461_s13] sm:$0xff] %vm2442_vm5, %v2426_v51 }
 0x233   : > { %v2312_v26 = vmul.f32 %v4445_v23, %v2294_v12 }
 0x235   : > { %v2330_v16 = vadd.f32 %v4452_v15, %v2312_v26 }
 0x236   : > { %v2251_v31 = vpop.f32.mrf.mxu1 }
 0x237   : > { %v2346_v6 = vmax.f32 %v2330_v16, 0.0  ;;  %v2252_v18 = vadd.f32 %v4439_v44, %v2251_v31 }
 0x239   : > { %v2427_v13 = vsel %vm2425_vm4, %v2346_v6, %v2380_v39  ;;  %v2295_v25 = vmax.f32 %v2252_v18, 0.0 }
 0x23a   : > { %2444 = vst.msk [vmem:[%s4461_s13 + $0x8] sm:$0xff] %vm2442_vm5, %v2427_v13 }
 0x23b   : > { %v2313_v7 = vmul.f32 %v4445_v23, %v2295_v25 }
 0x23d   : > { %v2331_v27 = vadd.f32 %v4452_v15, %v2313_v7 }
 0x23e   : > { %v2254_v9 = vpop.f32.mrf.mxu1 }
 0x23f   : > { %v2347_v57 = vmax.f32 %v2331_v27, 0.0  ;;  %v2255_v34 = vadd.f32 %v4439_v44, %v2254_v9 }
 0x241   : > { %v2428_v63 = vsel %vm2425_vm4, %v2347_v57, %v2382_v20  ;;  %v2296_v28 = vmax.f32 %v2255_v34, 0.0  ;;  %v2398_v57 = vpop.permute.xlu2 %2397 }
 0x242   : > { %2445 = vst.msk [vmem:[%s4461_s13 + $0x10] sm:$0xff] %vm2442_vm5, %v2428_v63 }
 0x243   : > { %v2314_v62 = vmul.f32 %v4445_v23, %v2296_v28 }
 0x245   : > { %v2332_v36 = vadd.f32 %v4452_v15, %v2314_v62 }
 0x246   : > { %v2257_v42 = vpop.f32.mrf.mxu1 }
 0x247   : > { %v2348_v41 = vmax.f32 %v2332_v36, 0.0  ;;  %v2258_v29 = vadd.f32 %v4439_v44, %v2257_v42  ;;  %v2400_v42 = vpop.permute.xlu0 %2399 }
 0x249   : > { %v2429_v48 = vsel %vm2425_vm4, %v2348_v41, %v2384_v50  ;;  %v2297_v60 = vmax.f32 %v2258_v29, 0.0 }
 0x24a   : > { %2446 = vst.msk [vmem:[%s4461_s13 + $0x18] sm:$0xff] %vm2442_vm5, %v2429_v48 }
 0x24b   : > { %v2315_v3 = vmul.f32 %v4445_v23, %v2297_v60 }
 0x24d   : > { %v2333_v10 = vadd.f32 %v4452_v15, %v2315_v3 }
 0x24e   : > { %v2260_v37 = vpop.f32.mrf.mxu1 }
 0x24f   : > { %v2349_v30 = vmax.f32 %v2333_v10, 0.0  ;;  %v2261_v21 = vadd.f32 %v4439_v44, %v2260_v37  ;;  %v2402_v37 = vpop.permute.xlu1 %2401 }
 0x251   : > { %v2430_v11 = vsel %vm2425_vm4, %v2349_v30, %v2386_v40  ;;  %v2298_v38 = vmax.f32 %v2261_v21, 0.0 }
 0x252   : > { %2447 = vst.msk [vmem:[%s4461_s13 + $0x20] sm:$0xff] %vm2442_vm5, %v2430_v11 }
 0x253   : > { %v2316_v2 = vmul.f32 %v4445_v23, %v2298_v38 }
 0x255   : > { %v2334_v55 = vadd.f32 %v4452_v15, %v2316_v2 }
 0x256   : > { %v2263_v56 = vpop.f32.mrf.mxu1 }
 0x257   : > { %v2350_v8 = vmax.f32 %v2334_v55, 0.0  ;;  %v2264_v14 = vadd.f32 %v4439_v44, %v2263_v56 }
 0x259   : > { %v2431_v1 = vsel %vm2425_vm4, %v2350_v8, %v2388_v59  ;;  %v2299_v24 = vmax.f32 %v2264_v14, 0.0  ;;  %v2404_v8 = vpop.permute.xlu2 %2403 }
 0x25a   : > { %2448 = vst.msk [vmem:[%s4461_s13 + $0x28] sm:$0xff] %vm2442_vm5, %v2431_v1 }
 0x25b   : > { %v2317_v17 = vmul.f32 %v4445_v23, %v2299_v24 }
 0x25d   : > { %v2335_v43 = vadd.f32 %v4452_v15, %v2317_v17 }
 0x25e   : > { %v2266_v32 = vpop.f32.mrf.mxu1 }
 0x25f   : > { %v2351_v47 = vmax.f32 %v2335_v43, 0.0  ;;  %v2267_v46 = vadd.f32 %v4439_v44, %v2266_v32 }
 0x261   : > { %v2432_v4 = vsel %vm2425_vm4, %v2351_v47, %v4447_v52  ;;  %v2300_v33 = vmax.f32 %v2267_v46, 0.0  ;;  %v2406_v46 = vpop.permute.xlu0 %2405 }
 0x262   : > { %2449 = vst.msk [vmem:[%s4461_s13 + $0x30] sm:$0xff] %vm2442_vm5, %v2432_v4 }
 0x263   : > { %v2318_v40 = vmul.f32 %v4445_v23, %v2300_v33 }
 0x265   : > { %v2336_v61 = vadd.f32 %v4452_v15, %v2318_v40 }
 0x266   : > { %v2269_v58 = vpop.f32.mrf.mxu1 }
 0x267   : > { %v2352_v0 = vmax.f32 %v2336_v61, 0.0  ;;  %v2270_v49 = vadd.f32 %v4439_v44, %v2269_v58  ;;  %v2408_v58 = vpop.permute.xlu1 %2407 }
 0x269   : > { %v2433_v45 = vsel %vm2425_vm4, %v2352_v0, %v4457_v53  ;;  %v2301_v22 = vmax.f32 %v2270_v49, 0.0 }
 0x26a   : > { %2450 = vst.msk [vmem:[%s4461_s13 + $0x38] sm:$0xff] %vm2442_vm5, %v2433_v45 }
 0x26b   : > { %v2319_v52 = vmul.f32 %v4445_v23, %v2301_v22 }
 0x26d   : > { %v2337_v19 = vadd.f32 %v4452_v15, %v2319_v52 }
 0x26e   : > { %v2272_v59 = vpop.f32.mrf.mxu1 }
 0x26f   : > { %v2353_v35 = vmax.f32 %v2337_v19, 0.0  ;;  %v2273_v51 = vadd.f32 %v4439_v44, %v2272_v59 }
 0x271   : > { %v2434_v12 = vsel %vm2425_vm4, %v2353_v35, %v2394_v54  ;;  %v2302_v26 = vmax.f32 %v2273_v51, 0.0 }
 0x272   : > { %2451 = vst.msk [vmem:[%s4461_s13 + $0x40] sm:$0xff] %vm2442_vm5, %v2434_v12 }
 0x273   : > { %v2320_v16 = vmul.f32 %v4445_v23, %v2302_v26 }
 0x275   : > { %v2338_v53 = vadd.f32 %v4452_v15, %v2320_v16 }
 0x276   : > { %v2275_v31 = vpop.f32.mrf.mxu1 }
 0x277   : > { %v2354_v6 = vmax.f32 %v2338_v53, 0.0  ;;  %v2276_v18 = vadd.f32 %v4439_v44, %v2275_v31 }
 0x279   : > { %v2435_v39 = vsel %vm2425_vm4, %v2354_v6, %v2396_v5  ;;  %v2303_v13 = vmax.f32 %v2276_v18, 0.0 }
 0x27a   : > { %2452 = vst.msk [vmem:[%s4461_s13 + $0x48] sm:$0xff] %vm2442_vm5, %v2435_v39 }
 0x27b   : > { %v2321_v25 = vmul.f32 %v4445_v23, %v2303_v13 }
 0x27d   : > { %v2339_v54 = vadd.f32 %v4452_v15, %v2321_v25 }
 0x27e   : > { %v2278_v7 = vpop.f32.mrf.mxu1 }
 0x27f   : > { %v2355_v27 = vmax.f32 %v2339_v54, 0.0  ;;  %v2279_v9 = vadd.f32 %v4439_v44, %v2278_v7 }
 0x281   : > { %v2436_v34 = vsel %vm2425_vm4, %v2355_v27, %v2398_v57  ;;  %v2304_v20 = vmax.f32 %v2279_v9, 0.0 }
 0x282   : > { %2453 = vst.msk [vmem:[%s4461_s13 + $0x50] sm:$0xff] %vm2442_vm5, %v2436_v34 }
 0x283   : > { %v2322_v5 = vmul.f32 %v4445_v23, %v2304_v20 }
 0x285   : > { %v2340_v63 = vadd.f32 %v4452_v15, %v2322_v5 }
 0x286   : > { %v2281_v28 = vpop.f32.mrf.mxu1 }
 0x287   : > { %v2356_v62 = vmax.f32 %v2340_v63, 0.0  ;;  %v2282_v36 = vadd.f32 %v4439_v44, %v2281_v28 }
 0x289   : > { %v2437_v41 = vsel %vm2425_vm4, %v2356_v62, %v2400_v42  ;;  %v2305_v29 = vmax.f32 %v2282_v36, 0.0 }
 0x28a   : > { %2454 = vst.msk [vmem:[%s4461_s13 + $0x58] sm:$0xff] %vm2442_vm5, %v2437_v41 }
 0x28b   : > { %v2323_v50 = vmul.f32 %v4445_v23, %v2305_v29 }
 0x28d   : > { %v2341_v48 = vadd.f32 %v4452_v15, %v2323_v50 }
 0x28e   : > { %v2284_v60 = vpop.f32.mrf.mxu1 }
 0x28f   : > { %v2357_v3 = vmax.f32 %v2341_v48, 0.0  ;;  %v2285_v10 = vadd.f32 %v4439_v44, %v2284_v60 }
 0x291   : > { %v2438_v30 = vsel %vm2425_vm4, %v2357_v3, %v2402_v37  ;;  %v2306_v21 = vmax.f32 %v2285_v10, 0.0 }
 0x292   : > { %2455 = vst.msk [vmem:[%s4461_s13 + $0x60] sm:$0xff] %vm2442_vm5, %v2438_v30 }
 0x293   : > { %v2324_v11 = vmul.f32 %v4445_v23, %v2306_v21 }
 0x295   : > { %v2342_v38 = vadd.f32 %v4452_v15, %v2324_v11 }
 0x296   : > { %v2287_v2 = vpop.f32.mrf.mxu1 }
 0x297   : > { %v2358_v55 = vmax.f32 %v2342_v38, 0.0  ;;  %v2288_v56 = vadd.f32 %v4439_v44, %v2287_v2 }
 0x299   : > { %v2439_v14 = vsel %vm2425_vm4, %v2358_v55, %v2404_v8  ;;  %v2307_v1 = vmax.f32 %v2288_v56, 0.0 }
 0x29a   : > { %2456 = vst.msk [vmem:[%s4461_s13 + $0x68] sm:$0xff] %vm2442_vm5, %v2439_v14 }
 0x29b   : > { %v2325_v24 = vmul.f32 %v4445_v23, %v2307_v1 }
 0x29d   : > { %v2343_v17 = vadd.f32 %v4452_v15, %v2325_v24 }
 0x29e   : > { %v2290_v43 = vpop.f32.mrf.mxu1 }
 0x29f   : > { %v2359_v32 = vmax.f32 %v2343_v17, 0.0  ;;  %v2291_v47 = vadd.f32 %v4439_v44, %v2290_v43 }
 0x2a1   : > { %v2440_v4 = vsel %vm2425_vm4, %v2359_v32, %v2406_v46  ;;  %v2308_v33 = vmax.f32 %v2291_v47, 0.0 }
 0x2a2   : > { %2457 = vst.msk [vmem:[%s4461_s13 + $0x70] sm:$0xff] %vm2442_vm5, %v2440_v4 }
 0x2a3   : > { %v2326_v40 = vmul.f32 %v4445_v23, %v2308_v33 }
 0x2a5   : > { %v2344_v44 = vadd.f32 %v4452_v15, %v2326_v40 }
 0x2a7   : > { %v2360_v61 = vmax.f32 %v2344_v44, 0.0 }
 0x2a9   : > { %v2441_v0 = vsel %vm2425_vm4, %v2360_v61, %v2408_v58 }
 0x2aa   : > { %2458 = vst.msk [vmem:[%s4461_s13 + $0x78] sm:$0xff] %vm2442_vm5, %v2441_v0 }
 0x2ab   : > { %2750 = shalt.err (!%p2747_p5)
}
 0x2ac   : > { %s2790_s18 = smov 128  }
 0x2ad   : > { %2649 = dma.vmem_to_hbm [thread:$0]  (%p2864_p6), %s2474_s19, 2048, %s2476_s20, %s2460_s25, %s2790_s18, %s2790_s18, %s2789_s11  }
 0x2ae PF: > { %s2490_s13 = sand.u32 1, %s2773_s21   ;;  %p2652_p7 = pnand %p2546_p9, %p2868_p8 }
 0x2af   : > { %s2491_s15 = scalar_lea.sflag [#allocation5], %s2490_s13 }
 0x2b0   : > { %p2653_p10 = pneg %p2652_p7 }
 0x2b2   : > { %2768 = dma.done.wait (%p2653_p10), %s2491_s15, 2048  }
 0x2b3   : > { %2770 = vsyncadd (%p2653_p10), %s2491_s15, 4294965248  ;;  %p16_p11 = scmp.ge.s32.totalorder %s2849_s27, 4   ;;  %s4614_s21 = smov %s2777_s22 }
 0x2b4   : > { %s4615_s22 = smov %s2781_s23  ;;  %s4616_s23 = smov %s2862_s30 }
 0x2b5   : > { %s4617_s24 = smov %s2849_s27  ;;  %18 = sbr.rel (!%p16_p11) target bundleno = 3 (0x3), region = 128 }
 0x2ba   :  { %2497 = vsyncpa [#allocation5], 1 }
 0x2bb   :  { %2499 = vsyncpa [#allocation5 + $0x1], 1 }

</bundles_post_ra>
